<compile_context>
chip_gen: v6e
topology: v6e:2x2x1
jax: 0.10.0
libtpu: 0.0.40
codegen_flags: <defaults>
</compile_context>

<pallas_src>
import jax
import jax.numpy as jnp
from jax import lax
from jax.experimental import pallas as pl
from jax.experimental.pallas import tpu as pltpu

EPS = 1e-5
CLIP_MAX = 20.0  # ClippedReLU(max_value=20)


# ---------------------------------------------------------------------------
# In-kernel conv helper: VALID 3x3 conv as ONE fused-K MXU dot.
# ---------------------------------------------------------------------------

def _conv3x3_valid_dot(xpad, w_bf16):
    """xpad: (Ho+2, Wo+2, Cin) f32 value; w_bf16: (9*Cin, Cout) bf16 value.

    Builds the im2col patch in-register (9 shifted taps concatenated along the
    contraction dim) and issues a single (Ho*Wo, 9*Cin) x (9*Cin, Cout) matmul
    with f32 accumulation.  Returns (Ho*Wo, Cout) f32.
    """
    Ho = xpad.shape[0] - 2
    Wo = xpad.shape[1] - 2
    taps = [
        xpad[kh:kh + Ho, kw:kw + Wo, :].reshape(Ho * Wo, -1)
        for kh in range(3) for kw in range(3)
    ]
    patch = jnp.concatenate(taps, axis=-1).astype(jnp.bfloat16)   # (Ho*Wo, 9*Cin)
    return jnp.dot(patch, w_bf16, preferred_element_type=jnp.float32)


# ---------------------------------------------------------------------------
# Pallas kernels (one grid step == one image)
# ---------------------------------------------------------------------------

def _stem_kernel(x_ref, w_ref, scale_ref, bias_ref, o_ref):
    """5x5/stride-2 conv (as VALID 3x3 on space-to-depth input) + BN + clip."""
    Ho, Wo, Cout = o_ref.shape
    y = _conv3x3_valid_dot(x_ref[...], w_ref[...])                # (Ho*Wo, Cout)
    y = y * scale_ref[...] + bias_ref[...]
    o_ref[...] = jnp.clip(y, 0.0, CLIP_MAX).reshape(Ho, Wo, Cout)


def _identity_block_kernel(x_ref, w1_ref, s1_ref, b1_ref, w2_ref, s2_ref,
                           b2_ref, o_ref, pad1_ref, pad2_ref):
    """Fused IdentityBlock: conv+BN+clip, conv+BN+clip, += residual, clip.

    The zero-padded conv inputs live in VMEM scratch; the intermediate
    activation never leaves VMEM.
    """
    Ho, Wo, C = o_ref.shape
    x = x_ref[...]                                                # (Ho, Wo, C) f32

    # conv1 + BN + ClippedReLU
    pad1_ref[...] = jnp.zeros(pad1_ref.shape, pad1_ref.dtype)
    pad1_ref[pl.ds(1, Ho), pl.ds(1, Wo), :] = x
    y1 = _conv3x3_valid_dot(pad1_ref[...], w1_ref[...])           # (Ho*Wo, C)
    y1 = jnp.clip(y1 * s1_ref[...] + b1_ref[...], 0.0, CLIP_MAX)

    # conv2 + BN + ClippedReLU (intermediate stays in VMEM scratch)
    pad2_ref[...] = jnp.zeros(pad2_ref.shape, pad2_ref.dtype)
    pad2_ref[pl.ds(1, Ho), pl.ds(1, Wo), :] = y1.reshape(Ho, Wo, C)
    y2 = _conv3x3_valid_dot(pad2_ref[...], w2_ref[...])
    y2 = jnp.clip(y2 * s2_ref[...] + b2_ref[...], 0.0, CLIP_MAX)

    # residual add + final ClippedReLU of the block
    o_ref[...] = jnp.clip(y2.reshape(Ho, Wo, C) + x, 0.0, CLIP_MAX)


# ---------------------------------------------------------------------------
# Host-side (tiny) layout prep — weights and stem space-to-depth
# ---------------------------------------------------------------------------

def _space_to_depth_pad2(x_nhwc):
    """Pad by 2 and fold 2x2 spatial blocks into channels (stride-2 stem prep).

    Pure layout change of the small network input (NOT a 25x im2col blow-up).
    """
    N, H, W, C = x_nhwc.shape
    if H % 2 or W % 2:
        raise ValueError("Pallas ConvResBlock path requires even H and W")
    xp = jnp.pad(x_nhwc, ((0, 0), (2, 2), (2, 2), (0, 0)))        # (N, H+4, W+4, C)
    Hs, Ws = (H + 4) // 2, (W + 4) // 2
    xs = xp.reshape(N, Hs, 2, Ws, 2, C).transpose(0, 1, 3, 2, 4, 5)
    return xs.reshape(N, Hs, Ws, 4 * C)


def _stem_weight_matrix(w_oihw):
    """(Cout, Cin, 5, 5) OIHW -> (9*4*Cin, Cout) bf16 matching the
    space-to-depth input layout and the kernel's (kh, kw, channel) tap order."""
    Cout, Cin = w_oihw.shape[:2]
    w = jnp.transpose(w_oihw, (2, 3, 1, 0))                       # (5, 5, Cin, Cout)
    w = jnp.pad(w, ((0, 1), (0, 1), (0, 0), (0, 0)))               # (6, 6, Cin, Cout)
    w = w.reshape(3, 2, 3, 2, Cin, Cout).transpose(0, 2, 1, 3, 4, 5)
    return w.reshape(9 * 4 * Cin, Cout).astype(jnp.bfloat16)


def _conv3x3_weight_matrix(w_oihw):
    """(Cout, Cin, 3, 3) OIHW -> (9*Cin, Cout) bf16 in (kh, kw, cin) order."""
    Cout, Cin = w_oihw.shape[:2]
    return jnp.transpose(w_oihw, (2, 3, 1, 0)).reshape(9 * Cin, Cout).astype(
        jnp.bfloat16)


# ---------------------------------------------------------------------------
# pallas_call wrappers
# ---------------------------------------------------------------------------

def _stem_call(xs2d, w_mat, scale, bias, Ho, Wo):
    N, Hs, Ws, Cs = xs2d.shape
    Cout = w_mat.shape[-1]
    return pl.pallas_call(
        _stem_kernel,
        out_shape=jax.ShapeDtypeStruct((N, Ho, Wo, Cout), jnp.float32),
        grid=(N,),
        in_specs=[
            pl.BlockSpec((None, Hs, Ws, Cs), lambda n: (n, 0, 0, 0)),
            pl.BlockSpec((9 * Cs, Cout), lambda n: (0, 0)),
            pl.BlockSpec((1, Cout), lambda n: (0, 0)),
            pl.BlockSpec((1, Cout), lambda n: (0, 0)),
        ],
        out_specs=pl.BlockSpec((None, Ho, Wo, Cout), lambda n: (n, 0, 0, 0)),
        compiler_params=pltpu.CompilerParams(
            dimension_semantics=("parallel",)),
    )(xs2d, w_mat, scale.reshape(1, Cout), bias.reshape(1, Cout))


def _identity_block_call(x, w1_mat, s1, b1, w2_mat, s2, b2):
    N, Ho, Wo, C = x.shape
    wspec = pl.BlockSpec((9 * C, C), lambda n: (0, 0))
    vspec = pl.BlockSpec((1, C), lambda n: (0, 0))
    return pl.pallas_call(
        _identity_block_kernel,
        out_shape=jax.ShapeDtypeStruct((N, Ho, Wo, C), jnp.float32),
        grid=(N,),
        in_specs=[
            pl.BlockSpec((None, Ho, Wo, C), lambda n: (n, 0, 0, 0)),
            wspec, vspec, vspec, wspec, vspec, vspec,
        ],
        out_specs=pl.BlockSpec((None, Ho, Wo, C), lambda n: (n, 0, 0, 0)),
        scratch_shapes=[
            pltpu.VMEM((Ho + 2, Wo + 2, C), jnp.float32),
            pltpu.VMEM((Ho + 2, Wo + 2, C), jnp.float32),
        ],
        compiler_params=pltpu.CompilerParams(
            dimension_semantics=("parallel",)),
    )(x, w1_mat, s1.reshape(1, C), b1.reshape(1, C),
      w2_mat, s2.reshape(1, C), b2.reshape(1, C))


def conv_res_block_forward(x_nchw, params):
    """ConvResBlock.forward — input/output in NCHW like PyTorch."""
    x = jnp.transpose(x_nchw, (0, 2, 3, 1)).astype(jnp.float32)   # NCHW -> NHWC
    N, H, W, _ = x.shape
    Ho, Wo = H // 2, W // 2

    stem = params["stem"]
    xs2d = _space_to_depth_pad2(x)
    x = _stem_call(xs2d, _stem_weight_matrix(stem["w"]),
                   stem["scale"], stem["bias"], Ho, Wo)

    for blk in params["blocks"]:   # 3 fused IdentityBlocks, one pallas_call each
        x = _identity_block_call(
            x,
            _conv3x3_weight_matrix(blk[0]["w"]), blk[0]["scale"], blk[0]["bias"],
            _conv3x3_weight_matrix(blk[1]["w"]), blk[1]["scale"], blk[1]["bias"])

    return jnp.transpose(x, (0, 3, 1, 2))                         # NHWC -> NCHW


# ---------------------------------------------------------------------------
# Deterministic parameter init (synthetic) + BN folding
# ---------------------------------------------------------------------------

def _fold_bn(b_conv, gamma, beta, mean, var):
    scale = gamma / jnp.sqrt(var + EPS)
    bias = (b_conv - mean) * scale + beta
    return scale, bias


def init_params(key, in_channels, out_channels):
    def conv_init(k, cout, cin, ksz):
        kw_, kb_ = jax.random.split(k)
        bound = 1.0 / (cin * ksz * ksz) ** 0.5
        w = jax.random.uniform(kw_, (cout, cin, ksz, ksz), jnp.float32,
                               -bound, bound)
        b = jax.random.uniform(kb_, (cout,), jnp.float32, -bound, bound)
        return w, b

    def bn_init(k, c):
        k1, k2, k3, k4 = jax.random.split(k, 4)
        gamma = jax.random.uniform(k1, (c,), jnp.float32, 0.9, 1.1)
        beta = jax.random.uniform(k2, (c,), jnp.float32, -0.1, 0.1)
        mean = jax.random.uniform(k3, (c,), jnp.float32, -0.1, 0.1)
        var = jax.random.uniform(k4, (c,), jnp.float32, 0.9, 1.1)
        return gamma, beta, mean, var

    keys = jax.random.split(key, 14)
    ki = iter(keys)

    w, b = conv_init(next(ki), out_channels, in_channels, 5)
    g, be, m, v = bn_init(next(ki), out_channels)
    s, bi = _fold_bn(b, g, be, m, v)
    params = {"stem": {"w": w, "scale": s, "bias": bi}, "blocks": []}

    for _ in range(3):
        block = []
        for _ in range(2):
            w, b = conv_init(next(ki), out_channels, out_channels, 3)
            g, be, m, v = bn_init(next(ki), out_channels)
            s, bi = _fold_bn(b, g, be, m, v)
            block.append({"w": w, "scale": s, "bias": bi})
        params["blocks"].append(tuple(block))
    return params


# ---------------------------------------------------------------------------
# Pure-JAX reference (mirrors the kernels' bf16-input / f32-accum precision)
# ---------------------------------------------------------------------------

def _ref_conv_bn_relu(x, w_oihw, scale, bias, stride, pad):
    w = jnp.transpose(w_oihw, (2, 3, 1, 0)).astype(jnp.bfloat16)  # OIHW -> HWIO
    y = lax.conv_general_dilated(
        x.astype(jnp.bfloat16), w, (stride, stride),
        [(pad, pad), (pad, pad)],
        dimension_numbers=("NHWC", "HWIO", "NHWC"),
        preferred_element_type=jnp.float32)
    y = y * scale + bias
    return jnp.clip(y, 0.0, CLIP_MAX)


def ref_forward(x_nchw, params):
    x = jnp.transpose(x_nchw, (0, 2, 3, 1)).astype(jnp.float32)
    stem = params["stem"]
    x = _ref_conv_bn_relu(x, stem["w"], stem["scale"], stem["bias"], 2, 2)
    for blk in params["blocks"]:
        r = x
        x = _ref_conv_bn_relu(x, blk[0]["w"], blk[0]["scale"], blk[0]["bias"], 1, 1)
        x = _ref_conv_bn_relu(x, blk[1]["w"], blk[1]["scale"], blk[1]["bias"], 1, 1)
        x = jnp.clip(x + r, 0.0, CLIP_MAX)
    return jnp.transpose(x, (0, 3, 1, 2))


# ---------------------------------------------------------------------------

if __name__ == "__main__":
    key = jax.random.PRNGKey(0)
    kx, kp = jax.random.split(key)

    N, Cin, H, W = 2, 4, 16, 16     # input NCHW like PyTorch
    Cout = 8
    x = jax.random.normal(kx, (N, Cin, H, W), jnp.float32)
    params = init_params(kp, Cin, Cout)

    out = jax.jit(conv_res_block_forward)(x, params)
    out = jax.block_until_ready(out)

    assert out.shape == (N, Cout, H // 2, W // 2), out.shape
    ref = ref_forward(x, params)
    # Both paths round conv inputs to bf16 and accumulate in f32; remaining
    # differences are summation-order only, so a tight-ish tolerance holds.
    if not bool(jnp.allclose(out, ref, rtol=1e-2, atol=1e-2)):
        raise AssertionError("Pallas output does not match reference")

    print("KERNEL_OK")
</pallas_src>

<mosaic_0001>
module attributes {stable_mosaic.version = 11 : i64} {
  func.func @_stem_kernel(%arg0: i32, %arg1: memref<1x10x10x16xf32, #tpu.memory_space<vmem>>, %arg2: memref<144x8xbf16, #tpu.memory_space<vmem>>, %arg3: memref<1x8xf32, #tpu.memory_space<vmem>>, %arg4: memref<1x8xf32, #tpu.memory_space<vmem>>, %arg5: memref<1x8x8x8xf32, #tpu.memory_space<vmem>>) attributes {dimension_semantics = [#tpu.dimension_semantics<parallel>], iteration_bounds = array<i64: 2>, scalar_prefetch = 0 : i64, scratch_operands = 0 : i64, tpu.core_type = #tpu.core_type<tc>, window_params = [{transform_indices = @transform_0, window_bounds = array<i64: 1, 10, 10, 16>}, {pipeline_mode = #tpu.pipeline_mode<synchronous>, transform_indices = @transform_1, window_bounds = array<i64: 144, 8>}, {pipeline_mode = #tpu.pipeline_mode<synchronous>, transform_indices = @transform_2, window_bounds = array<i64: 1, 8>}, {pipeline_mode = #tpu.pipeline_mode<synchronous>, transform_indices = @transform_3, window_bounds = array<i64: 1, 8>}, {transform_indices = @transform_4, window_bounds = array<i64: 1, 8, 8, 8>}]} {
    %c0 = arith.constant 0 : index
    %c0_0 = arith.constant 0 : index
    %c0_1 = arith.constant 0 : index
    %c0_2 = arith.constant 0 : index
    %0 = vector.load %arg1[%c0, %c0_0, %c0_1, %c0_2] : memref<1x10x10x16xf32, #tpu.memory_space<vmem>>, vector<1x10x10x16xf32>
    %1 = vector.shape_cast %0 : vector<1x10x10x16xf32> to vector<10x10x16xf32>
    %c0_3 = arith.constant 0 : index
    %c0_4 = arith.constant 0 : index
    %2 = vector.load %arg2[%c0_3, %c0_4] : memref<144x8xbf16, #tpu.memory_space<vmem>>, vector<144x8xbf16>
    %3 = vector.extract_strided_slice %1 {offsets = [0, 0, 0], sizes = [8, 8, 16], strides = [1, 1, 1]} : vector<10x10x16xf32> to vector<8x8x16xf32>
    %4 = vector.shape_cast %3 : vector<8x8x16xf32> to vector<64x16xf32>
    %5 = vector.extract_strided_slice %1 {offsets = [0, 1, 0], sizes = [8, 8, 16], strides = [1, 1, 1]} : vector<10x10x16xf32> to vector<8x8x16xf32>
    %6 = vector.shape_cast %5 : vector<8x8x16xf32> to vector<64x16xf32>
    %7 = vector.extract_strided_slice %1 {offsets = [0, 2, 0], sizes = [8, 8, 16], strides = [1, 1, 1]} : vector<10x10x16xf32> to vector<8x8x16xf32>
    %8 = vector.shape_cast %7 : vector<8x8x16xf32> to vector<64x16xf32>
    %9 = vector.extract_strided_slice %1 {offsets = [1, 0, 0], sizes = [8, 8, 16], strides = [1, 1, 1]} : vector<10x10x16xf32> to vector<8x8x16xf32>
    %10 = vector.shape_cast %9 : vector<8x8x16xf32> to vector<64x16xf32>
    %11 = vector.extract_strided_slice %1 {offsets = [1, 1, 0], sizes = [8, 8, 16], strides = [1, 1, 1]} : vector<10x10x16xf32> to vector<8x8x16xf32>
    %12 = vector.shape_cast %11 : vector<8x8x16xf32> to vector<64x16xf32>
    %13 = vector.extract_strided_slice %1 {offsets = [1, 2, 0], sizes = [8, 8, 16], strides = [1, 1, 1]} : vector<10x10x16xf32> to vector<8x8x16xf32>
    %14 = vector.shape_cast %13 : vector<8x8x16xf32> to vector<64x16xf32>
    %15 = vector.extract_strided_slice %1 {offsets = [2, 0, 0], sizes = [8, 8, 16], strides = [1, 1, 1]} : vector<10x10x16xf32> to vector<8x8x16xf32>
    %16 = vector.shape_cast %15 : vector<8x8x16xf32> to vector<64x16xf32>
    %17 = vector.extract_strided_slice %1 {offsets = [2, 1, 0], sizes = [8, 8, 16], strides = [1, 1, 1]} : vector<10x10x16xf32> to vector<8x8x16xf32>
    %18 = vector.shape_cast %17 : vector<8x8x16xf32> to vector<64x16xf32>
    %19 = vector.extract_strided_slice %1 {offsets = [2, 2, 0], sizes = [8, 8, 16], strides = [1, 1, 1]} : vector<10x10x16xf32> to vector<8x8x16xf32>
    %20 = vector.shape_cast %19 : vector<8x8x16xf32> to vector<64x16xf32>
    %21 = tpu.concatenate %4, %6, %8, %10, %12, %14, %16, %18, %20 in 1 : vector<64x16xf32>, vector<64x16xf32>, vector<64x16xf32>, vector<64x16xf32>, vector<64x16xf32>, vector<64x16xf32>, vector<64x16xf32>, vector<64x16xf32>, vector<64x16xf32> -> vector<64x144xf32>
    %22 = arith.truncf %21 : vector<64x144xf32> to vector<64x144xbf16>
    %cst = arith.constant dense<0.000000e+00> : vector<64x8xf32>
    %23 = tpu.matmul %22, %2, %cst {dimension_numbers = #tpu.dot_dimension_numbers<[1], [0], [0], [1], [0, 0, 1, 1], [], []>} : vector<64x144xbf16>, vector<144x8xbf16>, vector<64x8xf32> -> vector<64x8xf32>
    %c0_5 = arith.constant 0 : index
    %c0_6 = arith.constant 0 : index
    %24 = vector.load %arg3[%c0_5, %c0_6] : memref<1x8xf32, #tpu.memory_space<vmem>>, vector<1x8xf32>
    %25 = vector.broadcast %24 : vector<1x8xf32> to vector<64x8xf32>
    %26 = arith.mulf %23, %25 : vector<64x8xf32>
    %c0_7 = arith.constant 0 : index
    %c0_8 = arith.constant 0 : index
    %27 = vector.load %arg4[%c0_7, %c0_8] : memref<1x8xf32, #tpu.memory_space<vmem>>, vector<1x8xf32>
    %28 = vector.broadcast %27 : vector<1x8xf32> to vector<64x8xf32>
    %29 = arith.addf %26, %28 : vector<64x8xf32>
    %cst_9 = arith.constant 0.000000e+00 : f32
    %cst_10 = arith.constant 2.000000e+01 : f32
    %30 = vector.broadcast %cst_9 : f32 to vector<64x8xf32>
    %31 = arith.maximumf %30, %29 : vector<64x8xf32>
    %32 = vector.broadcast %cst_10 : f32 to vector<64x8xf32>
    %33 = arith.minimumf %32, %31 : vector<64x8xf32>
    %34 = vector.shape_cast %33 : vector<64x8xf32> to vector<8x8x8xf32>
    %c0_11 = arith.constant 0 : index
    %c0_12 = arith.constant 0 : index
    %c0_13 = arith.constant 0 : index
    %c0_14 = arith.constant 0 : index
    %35 = vector.load %arg5[%c0_11, %c0_12, %c0_13, %c0_14] : memref<1x8x8x8xf32, #tpu.memory_space<vmem>>, vector<1x8x8x8xf32>
    %36 = vector.shape_cast %35 : vector<1x8x8x8xf32> to vector<8x8x8xf32>
    %37 = vector.shape_cast %34 : vector<8x8x8xf32> to vector<1x8x8x8xf32>
    tpu.vector_store %arg5[%c0_11, %c0_12, %c0_13, %c0_14], %37 {strides = array<i32>} : memref<1x8x8x8xf32, #tpu.memory_space<vmem>>, vector<1x8x8x8xf32>,
    return
  }
  func.func @transform_0(%arg0: i32) -> (i32, i32, i32, i32) {
    %c0_i32 = arith.constant 0 : i32
    %c0_i32_0 = arith.constant 0 : i32
    %c0_i32_1 = arith.constant 0 : i32
    %c0_i32_2 = arith.constant 0 : i32
    return %arg0, %c0_i32, %c0_i32_0, %c0_i32_1 : i32, i32, i32, i32
  }
  func.func @transform_1(%arg0: i32) -> (i32, i32) {
    %c0_i32 = arith.constant 0 : i32
    %c0_i32_0 = arith.constant 0 : i32
    %c0_i32_1 = arith.constant 0 : i32
    return %c0_i32, %c0_i32_0 : i32, i32
  }
  func.func @transform_2(%arg0: i32) -> (i32, i32) {
    %c0_i32 = arith.constant 0 : i32
    %c0_i32_0 = arith.constant 0 : i32
    %c0_i32_1 = arith.constant 0 : i32
    return %c0_i32, %c0_i32_0 : i32, i32
  }
  func.func @transform_3(%arg0: i32) -> (i32, i32) {
    %c0_i32 = arith.constant 0 : i32
    %c0_i32_0 = arith.constant 0 : i32
    %c0_i32_1 = arith.constant 0 : i32
    return %c0_i32, %c0_i32_0 : i32, i32
  }
  func.func @transform_4(%arg0: i32) -> (i32, i32, i32, i32) {
    %c0_i32 = arith.constant 0 : i32
    %c0_i32_0 = arith.constant 0 : i32
    %c0_i32_1 = arith.constant 0 : i32
    %c0_i32_2 = arith.constant 0 : i32
    return %arg0, %c0_i32, %c0_i32_0, %c0_i32_1 : i32, i32, i32, i32
  }
}

module attributes {stable_mosaic.version = 11 : i64} {
  func.func @_identity_block_kernel(%arg0: i32, %arg1: memref<1x8x8x8xf32, #tpu.memory_space<vmem>>, %arg2: memref<72x8xbf16, #tpu.memory_space<vmem>>, %arg3: memref<1x8xf32, #tpu.memory_space<vmem>>, %arg4: memref<1x8xf32, #tpu.memory_space<vmem>>, %arg5: memref<72x8xbf16, #tpu.memory_space<vmem>>, %arg6: memref<1x8xf32, #tpu.memory_space<vmem>>, %arg7: memref<1x8xf32, #tpu.memory_space<vmem>>, %arg8: memref<1x8x8x8xf32, #tpu.memory_space<vmem>>, %arg9: memref<10x10x8xf32, #tpu.memory_space<vmem>>, %arg10: memref<10x10x8xf32, #tpu.memory_space<vmem>>) attributes {dimension_semantics = [#tpu.dimension_semantics<parallel>], iteration_bounds = array<i64: 2>, scalar_prefetch = 0 : i64, scratch_operands = 2 : i64, tpu.core_type = #tpu.core_type<tc>, window_params = [{transform_indices = @transform_0, window_bounds = array<i64: 1, 8, 8, 8>}, {pipeline_mode = #tpu.pipeline_mode<synchronous>, transform_indices = @transform_1, window_bounds = array<i64: 72, 8>}, {pipeline_mode = #tpu.pipeline_mode<synchronous>, transform_indices = @transform_2, window_bounds = array<i64: 1, 8>}, {pipeline_mode = #tpu.pipeline_mode<synchronous>, transform_indices = @transform_3, window_bounds = array<i64: 1, 8>}, {pipeline_mode = #tpu.pipeline_mode<synchronous>, transform_indices = @transform_4, window_bounds = array<i64: 72, 8>}, {pipeline_mode = #tpu.pipeline_mode<synchronous>, transform_indices = @transform_5, window_bounds = array<i64: 1, 8>}, {pipeline_mode = #tpu.pipeline_mode<synchronous>, transform_indices = @transform_6, window_bounds = array<i64: 1, 8>}, {transform_indices = @transform_7, window_bounds = array<i64: 1, 8, 8, 8>}]} {
    %c0 = arith.constant 0 : index
    %c0_0 = arith.constant 0 : index
    %c0_1 = arith.constant 0 : index
    %c0_2 = arith.constant 0 : index
    %0 = vector.load %arg1[%c0, %c0_0, %c0_1, %c0_2] : memref<1x8x8x8xf32, #tpu.memory_space<vmem>>, vector<1x8x8x8xf32>
    %1 = vector.shape_cast %0 : vector<1x8x8x8xf32> to vector<8x8x8xf32>
    %cst = arith.constant 0.000000e+00 : f32
    %2 = vector.broadcast %cst : f32 to vector<10x10x8xf32>
    %c0_3 = arith.constant 0 : index
    %c0_4 = arith.constant 0 : index
    %c0_5 = arith.constant 0 : index
    %3 = vector.load %arg9[%c0_3, %c0_4, %c0_5] : memref<10x10x8xf32, #tpu.memory_space<vmem>>, vector<10x10x8xf32>
    tpu.vector_store %arg9[%c0_3, %c0_4, %c0_5], %2 {strides = array<i32>} : memref<10x10x8xf32, #tpu.memory_space<vmem>>, vector<10x10x8xf32>,
    %c1 = arith.constant 1 : index
    %c1_6 = arith.constant 1 : index
    %c0_7 = arith.constant 0 : index
    %4 = vector.load %arg9[%c1, %c1_6, %c0_7] : memref<10x10x8xf32, #tpu.memory_space<vmem>>, vector<8x8x8xf32>
    tpu.vector_store %arg9[%c1, %c1_6, %c0_7], %1 {strides = array<i32>} : memref<10x10x8xf32, #tpu.memory_space<vmem>>, vector<8x8x8xf32>,
    %c0_8 = arith.constant 0 : index
    %c0_9 = arith.constant 0 : index
    %c0_10 = arith.constant 0 : index
    %5 = vector.load %arg9[%c0_8, %c0_9, %c0_10] : memref<10x10x8xf32, #tpu.memory_space<vmem>>, vector<10x10x8xf32>
    %c0_11 = arith.constant 0 : index
    %c0_12 = arith.constant 0 : index
    %6 = vector.load %arg2[%c0_11, %c0_12] : memref<72x8xbf16, #tpu.memory_space<vmem>>, vector<72x8xbf16>
    %7 = vector.extract_strided_slice %5 {offsets = [0, 0, 0], sizes = [8, 8, 8], strides = [1, 1, 1]} : vector<10x10x8xf32> to vector<8x8x8xf32>
    %8 = vector.shape_cast %7 : vector<8x8x8xf32> to vector<64x8xf32>
    %9 = vector.extract_strided_slice %5 {offsets = [0, 1, 0], sizes = [8, 8, 8], strides = [1, 1, 1]} : vector<10x10x8xf32> to vector<8x8x8xf32>
    %10 = vector.shape_cast %9 : vector<8x8x8xf32> to vector<64x8xf32>
    %11 = vector.extract_strided_slice %5 {offsets = [0, 2, 0], sizes = [8, 8, 8], strides = [1, 1, 1]} : vector<10x10x8xf32> to vector<8x8x8xf32>
    %12 = vector.shape_cast %11 : vector<8x8x8xf32> to vector<64x8xf32>
    %13 = vector.extract_strided_slice %5 {offsets = [1, 0, 0], sizes = [8, 8, 8], strides = [1, 1, 1]} : vector<10x10x8xf32> to vector<8x8x8xf32>
    %14 = vector.shape_cast %13 : vector<8x8x8xf32> to vector<64x8xf32>
    %15 = vector.extract_strided_slice %5 {offsets = [1, 1, 0], sizes = [8, 8, 8], strides = [1, 1, 1]} : vector<10x10x8xf32> to vector<8x8x8xf32>
    %16 = vector.shape_cast %15 : vector<8x8x8xf32> to vector<64x8xf32>
    %17 = vector.extract_strided_slice %5 {offsets = [1, 2, 0], sizes = [8, 8, 8], strides = [1, 1, 1]} : vector<10x10x8xf32> to vector<8x8x8xf32>
    %18 = vector.shape_cast %17 : vector<8x8x8xf32> to vector<64x8xf32>
    %19 = vector.extract_strided_slice %5 {offsets = [2, 0, 0], sizes = [8, 8, 8], strides = [1, 1, 1]} : vector<10x10x8xf32> to vector<8x8x8xf32>
    %20 = vector.shape_cast %19 : vector<8x8x8xf32> to vector<64x8xf32>
    %21 = vector.extract_strided_slice %5 {offsets = [2, 1, 0], sizes = [8, 8, 8], strides = [1, 1, 1]} : vector<10x10x8xf32> to vector<8x8x8xf32>
    %22 = vector.shape_cast %21 : vector<8x8x8xf32> to vector<64x8xf32>
    %23 = vector.extract_strided_slice %5 {offsets = [2, 2, 0], sizes = [8, 8, 8], strides = [1, 1, 1]} : vector<10x10x8xf32> to vector<8x8x8xf32>
    %24 = vector.shape_cast %23 : vector<8x8x8xf32> to vector<64x8xf32>
    %25 = tpu.concatenate %8, %10, %12, %14, %16, %18, %20, %22, %24 in 1 : vector<64x8xf32>, vector<64x8xf32>, vector<64x8xf32>, vector<64x8xf32>, vector<64x8xf32>, vector<64x8xf32>, vector<64x8xf32>, vector<64x8xf32>, vector<64x8xf32> -> vector<64x72xf32>
    %26 = arith.truncf %25 : vector<64x72xf32> to vector<64x72xbf16>
    %cst_13 = arith.constant dense<0.000000e+00> : vector<64x8xf32>
    %27 = tpu.matmul %26, %6, %cst_13 {dimension_numbers = #tpu.dot_dimension_numbers<[1], [0], [0], [1], [0, 0, 1, 1], [], []>} : vector<64x72xbf16>, vector<72x8xbf16>, vector<64x8xf32> -> vector<64x8xf32>
    %c0_14 = arith.constant 0 : index
    %c0_15 = arith.constant 0 : index
    %28 = vector.load %arg3[%c0_14, %c0_15] : memref<1x8xf32, #tpu.memory_space<vmem>>, vector<1x8xf32>
    %29 = vector.broadcast %28 : vector<1x8xf32> to vector<64x8xf32>
    %30 = arith.mulf %27, %29 : vector<64x8xf32>
    %c0_16 = arith.constant 0 : index
    %c0_17 = arith.constant 0 : index
    %31 = vector.load %arg4[%c0_16, %c0_17] : memref<1x8xf32, #tpu.memory_space<vmem>>, vector<1x8xf32>
    %32 = vector.broadcast %31 : vector<1x8xf32> to vector<64x8xf32>
    %33 = arith.addf %30, %32 : vector<64x8xf32>
    %cst_18 = arith.constant 0.000000e+00 : f32
    %cst_19 = arith.constant 2.000000e+01 : f32
    %34 = vector.broadcast %cst_18 : f32 to vector<64x8xf32>
    %35 = arith.maximumf %34, %33 : vector<64x8xf32>
    %36 = vector.broadcast %cst_19 : f32 to vector<64x8xf32>
    %37 = arith.minimumf %36, %35 : vector<64x8xf32>
    %cst_20 = arith.constant 0.000000e+00 : f32
    %38 = vector.broadcast %cst_20 : f32 to vector<10x10x8xf32>
    %c0_21 = arith.constant 0 : index
    %c0_22 = arith.constant 0 : index
    %c0_23 = arith.constant 0 : index
    %39 = vector.load %arg10[%c0_21, %c0_22, %c0_23] : memref<10x10x8xf32, #tpu.memory_space<vmem>>, vector<10x10x8xf32>
    tpu.vector_store %arg10[%c0_21, %c0_22, %c0_23], %38 {strides = array<i32>} : memref<10x10x8xf32, #tpu.memory_space<vmem>>, vector<10x10x8xf32>,
    %40 = vector.shape_cast %37 : vector<64x8xf32> to vector<8x8x8xf32>
    %c1_24 = arith.constant 1 : index
    %c1_25 = arith.constant 1 : index
    %c0_26 = arith.constant 0 : index
    %41 = vector.load %arg10[%c1_24, %c1_25, %c0_26] : memref<10x10x8xf32, #tpu.memory_space<vmem>>, vector<8x8x8xf32>
    tpu.vector_store %arg10[%c1_24, %c1_25, %c0_26], %40 {strides = array<i32>} : memref<10x10x8xf32, #tpu.memory_space<vmem>>, vector<8x8x8xf32>,
    %c0_27 = arith.constant 0 : index
    %c0_28 = arith.constant 0 : index
    %c0_29 = arith.constant 0 : index
    %42 = vector.load %arg10[%c0_27, %c0_28, %c0_29] : memref<10x10x8xf32, #tpu.memory_space<vmem>>, vector<10x10x8xf32>
    %c0_30 = arith.constant 0 : index
    %c0_31 = arith.constant 0 : index
    %43 = vector.load %arg5[%c0_30, %c0_31] : memref<72x8xbf16, #tpu.memory_space<vmem>>, vector<72x8xbf16>
    %44 = vector.extract_strided_slice %42 {offsets = [0, 0, 0], sizes = [8, 8, 8], strides = [1, 1, 1]} : vector<10x10x8xf32> to vector<8x8x8xf32>
    %45 = vector.shape_cast %44 : vector<8x8x8xf32> to vector<64x8xf32>
    %46 = vector.extract_strided_slice %42 {offsets = [0, 1, 0], sizes = [8, 8, 8], strides = [1, 1, 1]} : vector<10x10x8xf32> to vector<8x8x8xf32>
    %47 = vector.shape_cast %46 : vector<8x8x8xf32> to vector<64x8xf32>
    %48 = vector.extract_strided_slice %42 {offsets = [0, 2, 0], sizes = [8, 8, 8], strides = [1, 1, 1]} : vector<10x10x8xf32> to vector<8x8x8xf32>
    %49 = vector.shape_cast %48 : vector<8x8x8xf32> to vector<64x8xf32>
    %50 = vector.extract_strided_slice %42 {offsets = [1, 0, 0], sizes = [8, 8, 8], strides = [1, 1, 1]} : vector<10x10x8xf32> to vector<8x8x8xf32>
    %51 = vector.shape_cast %50 : vector<8x8x8xf32> to vector<64x8xf32>
    %52 = vector.extract_strided_slice %42 {offsets = [1, 1, 0], sizes = [8, 8, 8], strides = [1, 1, 1]} : vector<10x10x8xf32> to vector<8x8x8xf32>
    %53 = vector.shape_cast %52 : vector<8x8x8xf32> to vector<64x8xf32>
    %54 = vector.extract_strided_slice %42 {offsets = [1, 2, 0], sizes = [8, 8, 8], strides = [1, 1, 1]} : vector<10x10x8xf32> to vector<8x8x8xf32>
    %55 = vector.shape_cast %54 : vector<8x8x8xf32> to vector<64x8xf32>
    %56 = vector.extract_strided_slice %42 {offsets = [2, 0, 0], sizes = [8, 8, 8], strides = [1, 1, 1]} : vector<10x10x8xf32> to vector<8x8x8xf32>
    %57 = vector.shape_cast %56 : vector<8x8x8xf32> to vector<64x8xf32>
    %58 = vector.extract_strided_slice %42 {offsets = [2, 1, 0], sizes = [8, 8, 8], strides = [1, 1, 1]} : vector<10x10x8xf32> to vector<8x8x8xf32>
    %59 = vector.shape_cast %58 : vector<8x8x8xf32> to vector<64x8xf32>
    %60 = vector.extract_strided_slice %42 {offsets = [2, 2, 0], sizes = [8, 8, 8], strides = [1, 1, 1]} : vector<10x10x8xf32> to vector<8x8x8xf32>
    %61 = vector.shape_cast %60 : vector<8x8x8xf32> to vector<64x8xf32>
    %62 = tpu.concatenate %45, %47, %49, %51, %53, %55, %57, %59, %61 in 1 : vector<64x8xf32>, vector<64x8xf32>, vector<64x8xf32>, vector<64x8xf32>, vector<64x8xf32>, vector<64x8xf32>, vector<64x8xf32>, vector<64x8xf32>, vector<64x8xf32> -> vector<64x72xf32>
    %63 = arith.truncf %62 : vector<64x72xf32> to vector<64x72xbf16>
    %cst_32 = arith.constant dense<0.000000e+00> : vector<64x8xf32>
    %64 = tpu.matmul %63, %43, %cst_32 {dimension_numbers = #tpu.dot_dimension_numbers<[1], [0], [0], [1], [0, 0, 1, 1], [], []>} : vector<64x72xbf16>, vector<72x8xbf16>, vector<64x8xf32> -> vector<64x8xf32>
    %c0_33 = arith.constant 0 : index
    %c0_34 = arith.constant 0 : index
    %65 = vector.load %arg6[%c0_33, %c0_34] : memref<1x8xf32, #tpu.memory_space<vmem>>, vector<1x8xf32>
    %66 = vector.broadcast %65 : vector<1x8xf32> to vector<64x8xf32>
    %67 = arith.mulf %64, %66 : vector<64x8xf32>
    %c0_35 = arith.constant 0 : index
    %c0_36 = arith.constant 0 : index
    %68 = vector.load %arg7[%c0_35, %c0_36] : memref<1x8xf32, #tpu.memory_space<vmem>>, vector<1x8xf32>
    %69 = vector.broadcast %68 : vector<1x8xf32> to vector<64x8xf32>
    %70 = arith.addf %67, %69 : vector<64x8xf32>
    %cst_37 = arith.constant 0.000000e+00 : f32
    %cst_38 = arith.constant 2.000000e+01 : f32
    %71 = vector.broadcast %cst_37 : f32 to vector<64x8xf32>
    %72 = arith.maximumf %71, %70 : vector<64x8xf32>
    %73 = vector.broadcast %cst_38 : f32 to vector<64x8xf32>
    %74 = arith.minimumf %73, %72 : vector<64x8xf32>
    %75 = vector.shape_cast %74 : vector<64x8xf32> to vector<8x8x8xf32>
    %76 = arith.addf %75, %1 : vector<8x8x8xf32>
    %cst_39 = arith.constant 0.000000e+00 : f32
    %cst_40 = arith.constant 2.000000e+01 : f32
    %77 = vector.broadcast %cst_39 : f32 to vector<8x8x8xf32>
    %78 = arith.maximumf %77, %76 : vector<8x8x8xf32>
    %79 = vector.broadcast %cst_40 : f32 to vector<8x8x8xf32>
    %80 = arith.minimumf %79, %78 : vector<8x8x8xf32>
    %c0_41 = arith.constant 0 : index
    %c0_42 = arith.constant 0 : index
    %c0_43 = arith.constant 0 : index
    %c0_44 = arith.constant 0 : index
    %81 = vector.load %arg8[%c0_41, %c0_42, %c0_43, %c0_44] : memref<1x8x8x8xf32, #tpu.memory_space<vmem>>, vector<1x8x8x8xf32>
    %82 = vector.shape_cast %81 : vector<1x8x8x8xf32> to vector<8x8x8xf32>
    %83 = vector.shape_cast %80 : vector<8x8x8xf32> to vector<1x8x8x8xf32>
    tpu.vector_store %arg8[%c0_41, %c0_42, %c0_43, %c0_44], %83 {strides = array<i32>} : memref<1x8x8x8xf32, #tpu.memory_space<vmem>>, vector<1x8x8x8xf32>,
    return
  }
  func.func @transform_0(%arg0: i32) -> (i32, i32, i32, i32) {
    %c0_i32 = arith.constant 0 : i32
    %c0_i32_0 = arith.constant 0 : i32
    %c0_i32_1 = arith.constant 0 : i32
    %c0_i32_2 = arith.constant 0 : i32
    return %arg0, %c0_i32, %c0_i32_0, %c0_i32_1 : i32, i32, i32, i32
  }
  func.func @transform_1(%arg0: i32) -> (i32, i32) {
    %c0_i32 = arith.constant 0 : i32
    %c0_i32_0 = arith.constant 0 : i32
    %c0_i32_1 = arith.constant 0 : i32
    return %c0_i32, %c0_i32_0 : i32, i32
  }
  func.func @transform_2(%arg0: i32) -> (i32, i32) {
    %c0_i32 = arith.constant 0 : i32
    %c0_i32_0 = arith.constant 0 : i32
    %c0_i32_1 = arith.constant 0 : i32
    return %c0_i32, %c0_i32_0 : i32, i32
  }
  func.func @transform_3(%arg0: i32) -> (i32, i32) {
    %c0_i32 = arith.constant 0 : i32
    %c0_i32_0 = arith.constant 0 : i32
    %c0_i32_1 = arith.constant 0 : i32
    return %c0_i32, %c0_i32_0 : i32, i32
  }
  func.func @transform_4(%arg0: i32) -> (i32, i32) {
    %c0_i32 = arith.constant 0 : i32
    %c0_i32_0 = arith.constant 0 : i32
    %c0_i32_1 = arith.constant 0 : i32
    return %c0_i32, %c0_i32_0 : i32, i32
  }
  func.func @transform_5(%arg0: i32) -> (i32, i32) {
    %c0_i32 = arith.constant 0 : i32
    %c0_i32_0 = arith.constant 0 : i32
    %c0_i32_1 = arith.constant 0 : i32
    return %c0_i32, %c0_i32_0 : i32, i32
  }
  func.func @transform_6(%arg0: i32) -> (i32, i32) {
    %c0_i32 = arith.constant 0 : i32
    %c0_i32_0 = arith.constant 0 : i32
    %c0_i32_1 = arith.constant 0 : i32
    return %c0_i32, %c0_i32_0 : i32, i32
  }
  func.func @transform_7(%arg0: i32) -> (i32, i32, i32, i32) {
    %c0_i32 = arith.constant 0 : i32
    %c0_i32_0 = arith.constant 0 : i32
    %c0_i32_1 = arith.constant 0 : i32
    %c0_i32_2 = arith.constant 0 : i32
    return %arg0, %c0_i32, %c0_i32_0, %c0_i32_1 : i32, i32, i32, i32
  }
}

</mosaic_0001>

<bundles_post_ra>
// kernel: conv_res_block_forward.4
= control target key start
LH: loop header
LB: loop body
LE: loop exit
PB: predicated region body
PF: predicated region fallthrough
CT: control target
= control target key end

     0   :  { %s1058_s15 = smov 0   ;;  %s1403_s0 = inlined_call_operand.vmem [shape: f32[2,10,10,16], index: 0, kind: input, shape index: {}]   ;;  %s1404_s1 = inlined_call_operand.vmem [shape: bf16[144,8], index: 1, kind: input, shape index: {}]   ;;  %s1405_s2 = inlined_call_operand.vmem [shape: f32[1,8], index: 2, kind: input, shape index: {}]   ;;  %s1406_s3 = inlined_call_operand.vmem [shape: f32[1,8], index: 3, kind: input, shape index: {}]   ;;  %s1407_s4 = inlined_call_operand.vmem [shape: f32[2,8,8,8], index: 4, kind: output, shape index: {}]  }
   0x1 LB: > { %s807_s16 = sadd.s32 4294967295, %s1023_s15   ;;  %p811_p0 = scmp.ge.s32.totalorder %s1023_s15, 1  ;;  %s1023_s15 = sphi %s1058_s15, %s14_s15  }
   0x2   : > { %p162_p1 = scmp.lt.s32.totalorder %s1023_s15, 3 }
   0x4   : > { %p163_p2 = pnand %p811_p0, %p162_p1 }
   0x5   : > { %p188_p3 = scmp.lt.s32.totalorder (!%p163_p2), %s807_s16, 1  ;;  %s1026_s29 = smov (!%p163_p2), 48  }
   0x6   : > { %166 = sbr.rel (%p163_p2) target bundleno = 397 (0x18d), region = 36  ;;  %s1027_s6 = smov (!%p163_p2), 32  }
   0x7   : > { %s1028_s7 = smov (!%p163_p2), 16   ;;  %s1029_s12 = smov (!%p163_p2), 64  }
   0x8   : > { %s1030_s17 = smov (!%p163_p2), 80   ;;  %s1031_s20 = smov (!%p163_p2), 96  }
   0xb   : > { %v1008_v0 = vld [vmem:[%s1404_s1 + $0x38] sm:$0xff]   ;;  %v1025_v1 = vmov 0   ;;  %s1409_s16 = smov (!%p188_p3, %s807_s16), 1  ;;  %v1009_v2 = vld [vmem:[%s1404_s1 + $0x30] sm:$0xff]   ;;  %v1010_v3 = vld [vmem:[%s1404_s1 + $0x28] sm:$0xff]   ;;  %vm278_vm0 = vcmask 1045504  }
   0xc   : > { %632 = vmatprep.subr.bf16.mxu0 %v1025_v1  ;;  %833 = vmatprep.subr.bf16.mxu1 %v1025_v1  ;;  %s851_s21 = smul.u32 160, %s1409_s16  ;;  %vm253_vm1 = vcmask 1046528   ;;  %v1011_v13 = vld [vmem:[%s1404_s1 + $0x20] sm:$0xff]   ;;  %v1012_v44 = vld [vmem:[%s1404_s1 + $0x18] sm:$0xff]   ;;  %v1013_v58 = vld [vmem:[%s1404_s1 + $0x10] sm:$0xff]   ;;  %vm495_vm2 = vcmask 130048  }
   0xd   : > { %633 = vmatpush1.bf16.msra.mxu0 %v1008_v0  ;;  %842 = vmatpush1.bf16.msra.mxu1 %v1008_v0  ;;  %vm504_vm3 = vcmask 261120   ;;  %vm513_vm4 = vcmask 392192   ;;  %vm522_vm5 = vcmask 523264   ;;  %vm531_vm6 = vcmask 654336   ;;  %s832_s26 = sshll.u32 %s1409_s16, 6 }
   0xe   : > { %634 = vmatprep.subr.bf16.mxu0 %v1025_v1  ;;  %834 = vmatprep.subr.bf16.mxu1 %v1025_v1  ;;  %s1082_s24 = scalar_lea.vmem %s1403_s0, %s851_s21  ;;  %s1032_s21 = smov 112   ;;  %vm540_vm7 = vcmask 785408   ;;  %vm549_vm8 = vcmask 916480   ;;  %vm743_vm9 = vcmask 64512  }
   0xf   : > { %v1088_v4 = vld [vmem:[%s1082_s24 + $0x50] sm:$0xff]  ;;  %v1091_v5 = vld [vmem:[%s1082_s24 + $0x60] sm:$0xff]  ;;  %v200_v10 = vld [vmem:[%s1082_s24 + $0x8] sm:$0x3] }
  0x10   : > { %v1094_v6 = vld [vmem:[%s1082_s24 + $0x10] sm:$0xff]  ;;  %v873_v7 = vpack.i.bf16 %v1091_v5, %v1088_v4  ;;  %v1101_v8 = vld [vmem:[%s1082_s24 + $0x20] sm:$0xff]  ;;  %v202_v15 = vld [vmem:[%s1082_s24 + $0x18] sm:$0x3]  ;;  %v280_v17 = vrot.slane %v200_v10, 2  ;;  %v255_v21 = vrot.slane %v200_v10, 1 }
  0x11   : > { %635 = vmatpush1.bf16.msra.mxu0 %v1009_v2  ;;  %843 = vmatpush1.bf16.msra.mxu1 %v1009_v2  ;;  %v1104_v9 = vld [vmem:[%s1082_s24] sm:$0xff]  ;;  %v282_v11 = vrot.slane %v1094_v6, 2  ;;  %v257_v12 = vrot.slane %v1094_v6, 1  ;;  %v868_v14 = vpack.i.bf16 %v1101_v8, %v1094_v6  ;;  %v283_v20 = vrot.slane %v202_v15, 2  ;;  %v208_v23 = vld [vmem:[%s1082_s24 + $0x48] sm:$0x3] }
  0x12   : > { %636 = vmatprep.subr.bf16.mxu0 %v1025_v1  ;;  %835 = vmatprep.subr.bf16.mxu1 %v1025_v1  ;;  %v279_v16 = vrot.slane %v1104_v9, 2  ;;  %v254_v18 = vrot.slane %v1104_v9, 1  ;;  %v1118_v19 = vld [vmem:[%s1082_s24 + $0x40] sm:$0xff]  ;;  %v258_v22 = vrot.slane %v202_v15, 1  ;;  %v210_v26 = vld [vmem:[%s1082_s24 + $0x58] sm:$0x3] }
  0x13   : > { %874 = vrot.lane.b32.xlu1 %v873_v7, %s1026_s29  ;;  %v291_v24 = vrot.slane %v1118_v19, 2  ;;  %869 = vrot.lane.b32.xlu0 %v868_v14, %s1026_s29  ;;  %v292_v27 = vrot.slane %v208_v23, 2  ;;  %v294_v28 = vrot.slane %v1088_v4, 2  ;;  %v266_v29 = vrot.slane %v1118_v19, 1  ;;  %v212_v34 = vld [vmem:[%s1082_s24 + $0x68] sm:$0x3] }
  0x14   : > { %v281_v25 = vsel %vm278_vm0, %v279_v16, %v280_v17  ;;  %v1129_v30 = vsel %vm278_vm0, %v282_v11, %v283_v20  ;;  %v256_v31 = vsel %vm253_vm1, %v254_v18, %v255_v21  ;;  %v259_v32 = vsel %vm253_vm1, %v257_v12, %v258_v22  ;;  %v204_v39 = vld [vmem:[%s1082_s24 + $0x28] sm:$0x3]  ;;  %v1186_v63 = vld [vmem:[%s1082_s24 + $0x70] sm:$0xff]  ;;  %v214_v2 = vld [vmem:[%s1082_s24 + $0x78] sm:$0x3] }
  0x15   : > { %637 = vmatpush1.bf16.msra.mxu0 %v1010_v3  ;;  %844 = vmatpush1.bf16.msra.mxu1 %v1010_v3  ;;  %v295_v33 = vrot.slane %v210_v26, 2  ;;  %v888_v35 = vpack.i.bf16 %v1129_v30, %v281_v25  ;;  %v878_v36 = vpack.i.bf16 %v259_v32, %v256_v31  ;;  %v1138_v37 = vsel %vm278_vm0, %v291_v24, %v292_v27  ;;  %v1190_v0 = vld [vmem:[%s1082_s24 + $0x30] sm:$0xff]  ;;  %v206_v3 = vld [vmem:[%s1082_s24 + $0x38] sm:$0x3]  ;;  %v1014_v7 = vld [vmem:[%s1404_s1 + $0x8] sm:$0xff]  }
  0x16   : > { %638 = vmatprep.subr.bf16.mxu0 %v1025_v1  ;;  %836 = vmatprep.subr.bf16.mxu1 %v1025_v1  ;;  %v267_v38 = vrot.slane %v208_v23, 1  ;;  %v269_v41 = vrot.slane %v1088_v4, 1  ;;  %v270_v42 = vrot.slane %v210_v26, 1  ;;  %v272_v43 = vrot.slane %v1091_v5, 1  ;;  %v1205_v12 = vld [vmem:[%s1082_s24 + $0x88] sm:$0x3] }
  0x17   : > { %v1142_v40 = vsel %vm278_vm0, %v294_v28, %v295_v33  ;;  %889 = vrot.lane.b32.xlu1 %v888_v35, %s1027_s6  ;;  %879 = vrot.lane.b32.xlu0 %v878_v36, %s1028_s7  ;;  %v273_v47 = vrot.slane %v212_v34, 1  ;;  %v260_v48 = vrot.slane %v1101_v8, 1  ;;  %v261_v50 = vrot.slane %v204_v39, 1  ;;  %v1210_v17 = vld [vmem:[%s1082_s24 + $0x80] sm:$0xff]  ;;  %v1213_v18 = vld [vmem:[%s1082_s24 + $0x90] sm:$0xff] }
  0x18   : > { %v893_v45 = vpack.i.bf16 %v1142_v40, %v1138_v37  ;;  %v1154_v46 = vsel %vm253_vm1, %v266_v29, %v267_v38  ;;  %v271_v49 = vsel %vm253_vm1, %v269_v41, %v270_v42  ;;  %v297_v51 = vrot.slane %v1091_v5, 2  ;;  %v1218_v24 = vld [vmem:[%s1082_s24 + $0x98] sm:$0x3]  ;;  %v1015_v29 = vld [vmem:[%s1404_s1] sm:$0xff]  }
  0x19   : > { %639 = vmatpush1.bf16.msra.mxu0 %v1011_v13  ;;  %v298_v52 = vrot.slane %v212_v34, 2  ;;  %845 = vmatpush1.bf16.msra.mxu1 %v1011_v13  ;;  %v1161_v53 = vpack.i.bf16 %v271_v49, %v1154_v46  ;;  %v1164_v54 = vsel %vm253_vm1, %v272_v43, %v273_v47  ;;  %v285_v55 = vrot.slane %v1101_v8, 2  ;;  %v1016_v41 = vld [vmem:[%s1404_s1 + $0x40] sm:$0xff]  }
  0x1a   : > { %640 = vmatprep.subr.bf16.mxu0 %v1025_v1  ;;  %v286_v56 = vrot.slane %v204_v39, 2  ;;  %837 = vmatprep.subr.bf16.mxu1 %v1025_v1  ;;  %v1169_v57 = vsel %vm253_vm1, %v260_v48, %v261_v50  ;;  %v903_v59 = vpack.i.bf16 %v1164_v54, %v271_v49  ;;  %v275_v13 = vrot.slane %v1186_v63, 1 }
  0x1b   : > { %894 = vrot.lane.b32.xlu1 %v893_v45, %s1027_s6  ;;  %884 = vrot.lane.b32.xlu0 %v1161_v53, %s1028_s7  ;;  %v898_v60 = vpack.i.bf16 %v1169_v57, %v259_v32  ;;  %v1180_v61 = vsel %vm278_vm0, %v297_v51, %v298_v52  ;;  %v276_v14 = vrot.slane %v214_v2, 1  ;;  %v263_v15 = vrot.slane %v1190_v0, 1 }
  0x1c   : > { %v1183_v62 = vsel %vm278_vm0, %v285_v55, %v286_v56  ;;  %v913_v10 = vpack.i.bf16 %v1180_v61, %v1142_v40  ;;  %v264_v16 = vrot.slane %v206_v3, 1  ;;  %v300_v20 = vrot.slane %v1186_v63, 2 }
  0x1d   : > { %641 = vmatpush1.bf16.msra.mxu0 %v1012_v44  ;;  %846 = vmatpush1.bf16.msra.mxu1 %v1012_v44  ;;  %v908_v11 = vpack.i.bf16 %v1183_v62, %v1129_v30  ;;  %v301_v21 = vrot.slane %v214_v2, 2  ;;  %v288_v22 = vrot.slane %v1190_v0, 2  ;;  %v289_v23 = vrot.slane %v206_v3, 2 }
  0x1e   : > { %642 = vmatprep.subr.bf16.mxu0 %v1025_v1  ;;  %838 = vmatprep.subr.bf16.mxu1 %v1025_v1  ;;  %v308_v25 = vrot.slane %v1210_v17, 2  ;;  %v309_v26 = vrot.slane %v1205_v12, 2  ;;  %v316_v27 = vrot.slane %v1213_v18, 2  ;;  %v317_v28 = vrot.slane %v1218_v24, 2 }
  0x1f   : > { %904 = vrot.lane.b32.xlu1 %v903_v59, %s1029_s12  ;;  %899 = vrot.lane.b32.xlu0 %v898_v60, %s1029_s12  ;;  %v923_v30 = vpack.i.bf16 %v1186_v63, %v1091_v5  ;;  %v918_v31 = vpack.i.bf16 %v1190_v0, %v1101_v8  ;;  %v277_v32 = vsel %vm253_vm1, %v275_v13, %v276_v14  ;;  %v306_v49 = vrot.slane %v1205_v12, 1 }
  0x20   : > { %v265_v33 = vsel %vm253_vm1, %v263_v15, %v264_v16  ;;  %v1238_v34 = vsel %vm278_vm0, %v308_v25, %v309_v26  ;;  %v1241_v35 = vsel %vm278_vm0, %v316_v27, %v317_v28  ;;  %v290_v36 = vsel %vm278_vm0, %v288_v22, %v289_v23 }
  0x21   : > { %643 = vmatpush1.bf16.msra.mxu0 %v1013_v58  ;;  %847 = vmatpush1.bf16.msra.mxu1 %v1013_v58  ;;  %v565_v38 = vpack.c.bf16 %v1241_v35, %v1238_v34  ;;  %v302_v39 = vsel %vm278_vm0, %v300_v20, %v301_v21  ;;  %v559_v42 = vpack.c.bf16 %v290_v36, %v1183_v62  ;;  %v313_v59 = vrot.slane %v1213_v18, 1 }
  0x22   : > { %644 = vmatprep.subr.bf16.mxu0 %v1025_v1  ;;  %839 = vmatprep.subr.bf16.mxu1 %v1025_v1  ;;  %v933_v43 = vpack.i.bf16 %v277_v32, %v1164_v54  ;;  %v928_v44 = vpack.i.bf16 %v265_v33, %v1169_v57  ;;  %v563_v45 = vpack.c.bf16 %v302_v39, %v1180_v61  ;;  %v314_v60 = vrot.slane %v1218_v24, 1 }
  0x23   : > { %914 = vrot.lane.b32.xlu1 %v913_v10, %s1030_s17  ;;  %909 = vrot.lane.b32.xlu0 %v908_v11, %s1030_s17  ;;  %v953_v47 = vpack.i.bf16 %v302_v39, %v1180_v61  ;;  %v948_v48 = vpack.i.bf16 %v290_v36, %v1183_v62  ;;  %v963_v50 = vpack.i.bf16 %v1210_v17, %v1186_v63 }
  0x24   : > { %824 = vmatprep.mubr.msk.bf16.mxu0 %vm495_vm2, %v559_v42  ;;  %826 = vmatprep.mubr.msk.bf16.mxu1 %vm495_vm2, %v563_v45  ;;  %v958_v51 = vpack.i.bf16 %v1118_v19, %v1190_v0  ;;  %v968_v55 = vpack.i.bf16 %v1154_v46, %v265_v33  ;;  %v561_v56 = vpack.c.bf16 %v1142_v40, %v1138_v37 }
  0x25   : > { %645 = vmatpush1.bf16.msra.mxu0 %v1014_v7  ;;  %848 = vmatpush1.bf16.msra.mxu1 %v1014_v7  ;;  %v983_v57 = vpack.i.bf16 %v1238_v34, %v302_v39  ;;  %v978_v58 = vpack.i.bf16 %v1138_v37, %v290_v36  ;;  %v993_v46 = vpack.i.bf16 %v1213_v18, %v1210_v17 }
  0x26   : > { %646 = vmatprep.subr.bf16.mxu0 %v1025_v1  ;;  %840 = vmatprep.subr.bf16.mxu1 %v1025_v1  ;;  %v988_v61 = vpack.i.bf16 %v1088_v4, %v1118_v19  ;;  %v315_v62 = vsel %vm253_vm1, %v313_v59, %v314_v60 }
  0x27   : > { %924 = vrot.lane.b32.xlu1 %v923_v30, %s1031_s20  ;;  %919 = vrot.lane.b32.xlu0 %v918_v31, %s1031_s20 }
  0x29   : > { %647 = vmatpush1.bf16.msra.mxu0 %v1015_v29  ;;  %849 = vmatpush1.bf16.msra.mxu1 %v1015_v29 }
  0x2a   : > { %662 = vmatprep.subr.bf16.mxu0 %v1025_v1  ;;  %841 = vmatprep.subr.bf16.mxu1 %v1025_v1  ;;  %v305_v1 = vrot.slane %v1210_v17, 1 }
  0x2b   : > { %934 = vrot.lane.b32.xlu1 %v933_v43, %s1032_s21  ;;  %929 = vrot.lane.b32.xlu0 %v928_v44, %s1032_s21 }
  0x2c   : > { %v307_v52 = vsel %vm253_vm1, %v305_v1, %v306_v49 }
  0x2d   : > { %663 = vmatpush2.bf16.msra.mxu0 %v1016_v41  ;;  %850 = vmatpush2.bf16.msra.mxu1 %v1016_v41  ;;  %v973_v54 = vpack.i.bf16 %v307_v52, %v277_v32  ;;  %v1003_v2 = vpack.i.bf16 %v315_v62, %v307_v52 }
  0x2f   : > { %944 = vrot.lane.b32.xlu1 %v933_v43, %s1028_s7  ;;  %939 = vrot.lane.b32.xlu0 %v928_v44, %s1028_s7 }
  0x33   : > { %954 = vrot.lane.b32.xlu1 %v953_v47, %s1027_s6  ;;  %949 = vrot.lane.b32.xlu0 %v948_v48, %s1027_s6 }
  0x37   : > { %964 = vrot.lane.b32.xlu1 %v963_v50, %s1026_s29  ;;  %959 = vrot.lane.b32.xlu0 %v958_v51, %s1026_s29  ;;  %s1382_s29 = scalar_lea.vmem %s1407_s4, %s832_s26 }
  0x3b   : > { %974 = vrot.lane.b32.xlu1 %v973_v54, %s1029_s12  ;;  %969 = vrot.lane.b32.xlu0 %v968_v55, %s1029_s12 }
  0x3f   : > { %984 = vrot.lane.b32.xlu1 %v983_v57, %s1030_s17  ;;  %979 = vrot.lane.b32.xlu0 %v978_v58, %s1030_s17 }
  0x43   : > { %994 = vrot.lane.b32.xlu1 %v993_v46, %s1031_s20  ;;  %989 = vrot.lane.b32.xlu0 %v988_v61, %s1031_s20 }
  0x47   : > { %1004 = vrot.lane.b32.xlu1 %v1003_v2, %s1032_s21  ;;  %999 = vrot.lane.b32.xlu0 %v1161_v53, %s1032_s21 }
  0x85   : > { %v875_v3 = vpop.permute.xlu1 %874  ;;  %v870_v7 = vpop.permute.xlu0 %869 }
  0x86   : > { %v877_v31 = vunpack.i.h.bf16 %v875_v3  ;;  %v872_v32 = vunpack.i.h.bf16 %v870_v7  ;;  %v871_v33 = vunpack.i.l.bf16 %v870_v7 }
  0x89   : > { %v890_v10 = vpop.permute.xlu1 %889  ;;  %v880_v11 = vpop.permute.xlu0 %879 }
  0x8a   : > { %v882_v16 = vunpack.i.h.bf16 %v880_v11  ;;  %v881_v17 = vunpack.i.l.bf16 %v880_v11  ;;  %v892_v24 = vunpack.i.h.bf16 %v890_v10  ;;  %v891_v25 = vunpack.i.l.bf16 %v890_v10 }
  0x8c   : > { %v497_v26 = vsel %vm495_vm2, %v1094_v6, %v882_v16  ;;  %v496_v27 = vsel %vm495_vm2, %v1104_v9, %v881_v17 }
  0x8d   : > { %v895_v12 = vpop.permute.xlu1 %894  ;;  %v885_v13 = vpop.permute.xlu0 %884  ;;  %v506_v36 = vsel %vm504_vm3, %v497_v26, %v892_v24  ;;  %v505_v6 = vsel %vm504_vm3, %v496_v27, %v891_v25 }
  0x8e   : > { %v887_v14 = vunpack.i.h.bf16 %v885_v13  ;;  %v886_v15 = vunpack.i.l.bf16 %v885_v13  ;;  %v897_v18 = vunpack.i.h.bf16 %v895_v12  ;;  %v896_v20 = vunpack.i.l.bf16 %v895_v12 }
  0x8f   : > { %v514_v51 = vsel %vm513_vm4, %v505_v6, %v871_v33  ;;  %v515_v52 = vsel %vm513_vm4, %v506_v36, %v872_v32 }
  0x90   : > { %v501_v23 = vsel %vm495_vm2, %v1088_v4, %v887_v14  ;;  %v500_v53 = vsel %vm495_vm2, %v1118_v19, %v886_v15  ;;  %v876_v19 = vunpack.i.l.bf16 %v875_v3 }
  0x91   : > { %v905_v21 = vpop.permute.xlu1 %904  ;;  %v900_v22 = vpop.permute.xlu0 %899  ;;  %v510_v28 = vsel %vm504_vm3, %v501_v23, %v897_v18  ;;  %v509_v29 = vsel %vm504_vm3, %v500_v53, %v896_v20 }
  0x92   : > { %v907_v39 = vunpack.i.h.bf16 %v905_v21  ;;  %v906_v41 = vunpack.i.l.bf16 %v905_v21  ;;  %v518_v9 = vsel %vm513_vm4, %v509_v29, %v876_v19  ;;  %v519_v42 = vsel %vm513_vm4, %v510_v28, %v877_v31 }
  0x93   : > { %v902_v43 = vunpack.i.h.bf16 %v900_v22  ;;  %v901_v44 = vunpack.i.l.bf16 %v900_v22 }
  0x94   : > { %v527_v59 = vsel %vm522_vm5, %v518_v9, %v906_v41  ;;  %v528_v60 = vsel %vm522_vm5, %v519_v42, %v907_v39 }
  0x95   : > { %v915_v4 = vpop.permute.xlu1 %914  ;;  %v910_v30 = vpop.permute.xlu0 %909  ;;  %v523_v46 = vsel %vm522_vm5, %v514_v51, %v901_v44  ;;  %v524_v61 = vsel %vm522_vm5, %v515_v52, %v902_v43 }
  0x96   : > { %v917_v45 = vunpack.i.h.bf16 %v915_v4  ;;  %v916_v47 = vunpack.i.l.bf16 %v915_v4  ;;  %v912_v48 = vunpack.i.h.bf16 %v910_v30  ;;  %v911_v1 = vunpack.i.l.bf16 %v910_v30 }
  0x98   : > { %v536_v62 = vsel %vm531_vm6, %v527_v59, %v916_v47  ;;  %v537_v2 = vsel %vm531_vm6, %v528_v60, %v917_v45  ;;  %v532_v3 = vsel %vm531_vm6, %v523_v46, %v911_v1  ;;  %v533_v7 = vsel %vm531_vm6, %v524_v61, %v912_v48 }
  0x99   : > { %v925_v49 = vpop.permute.xlu1 %924  ;;  %v920_v50 = vpop.permute.xlu0 %919 }
  0x9a   : > { %v927_v54 = vunpack.i.h.bf16 %v925_v49  ;;  %v926_v55 = vunpack.i.l.bf16 %v925_v49  ;;  %v922_v57 = vunpack.i.h.bf16 %v920_v50  ;;  %v921_v58 = vunpack.i.l.bf16 %v920_v50 }
  0x9c   : > { %v545_v16 = vsel %vm540_vm7, %v536_v62, %v926_v55  ;;  %v546_v17 = vsel %vm540_vm7, %v537_v2, %v927_v54  ;;  %v541_v18 = vsel %vm540_vm7, %v532_v3, %v921_v58  ;;  %v542_v20 = vsel %vm540_vm7, %v533_v7, %v922_v57 }
  0x9d   : > { %v935_v10 = vpop.permute.xlu1 %934  ;;  %v930_v11 = vpop.permute.xlu0 %929 }
  0x9e   : > { %v937_v12 = vunpack.i.h.bf16 %v935_v10  ;;  %v936_v13 = vunpack.i.l.bf16 %v935_v10  ;;  %v932_v14 = vunpack.i.h.bf16 %v930_v11  ;;  %v931_v15 = vunpack.i.l.bf16 %v930_v11 }
  0xa0   : > { %v550_v21 = vsel %vm549_vm8, %v541_v18, %v931_v15  ;;  %v551_v22 = vsel %vm549_vm8, %v542_v20, %v932_v14  ;;  %v554_v23 = vsel %vm549_vm8, %v545_v16, %v936_v13  ;;  %v555_v53 = vsel %vm549_vm8, %v546_v17, %v937_v12 }
  0xa1   : > { %v945_v24 = vpop.permute.xlu1 %944  ;;  %v940_v25 = vpop.permute.xlu0 %939  ;;  %v558_v26 = vpack.c.bf16 %v551_v22, %v550_v21  ;;  %v562_v27 = vpack.c.bf16 %v555_v53, %v554_v23 }
  0xa2   : > { %v947_v31 = vunpack.i.h.bf16 %v945_v24  ;;  %v946_v19 = vunpack.i.l.bf16 %v945_v24  ;;  %v942_v32 = vunpack.i.h.bf16 %v940_v25  ;;  %v941_v33 = vunpack.i.l.bf16 %v940_v25 }
  0xa3   : > { %665 = vmatmul.mubr.bf16.vlgmr.msra.gmra.mxu0 %v558_v26  ;;  %681 = vmatmul.mubr.bf16.vlgmr.msra.gmra.mxu1 %v562_v27 }
  0xa4   : > { %825 = vmatprep.mubr.msk.bf16.mxu0 %vm495_vm2, %v561_v56  ;;  %827 = vmatprep.mubr.msk.bf16.mxu1 %vm495_vm2, %v565_v38  ;;  %v503_v56 = vsel %vm495_vm2, %v1186_v63, %v947_v31  ;;  %v502_v34 = vsel %vm495_vm2, %v1091_v5, %v946_v19  ;;  %v499_v35 = vsel %vm495_vm2, %v1190_v0, %v942_v32  ;;  %v828_v32 = vld [vmem:[%s1405_s2] ss:$0 sm:$0xff] }
  0xa5   : > { %v955_v28 = vpop.permute.xlu1 %954  ;;  %v950_v29 = vpop.permute.xlu0 %949  ;;  %v498_v38 = vsel %vm495_vm2, %v1101_v8, %v941_v33 }
  0xa6   : > { %v957_v39 = vunpack.i.h.bf16 %v955_v28  ;;  %v956_v41 = vunpack.i.l.bf16 %v955_v28  ;;  %v952_v37 = vunpack.i.h.bf16 %v950_v29  ;;  %v951_v40 = vunpack.i.l.bf16 %v950_v29 }
  0xa8   : > { %v511_v48 = vsel %vm504_vm3, %v502_v34, %v956_v41  ;;  %v512_v1 = vsel %vm504_vm3, %v503_v56, %v957_v39  ;;  %v507_v63 = vsel %vm504_vm3, %v498_v38, %v951_v40  ;;  %v508_v5 = vsel %vm504_vm3, %v499_v35, %v952_v37 }
  0xa9   : > { %v965_v4 = vpop.permute.xlu1 %964  ;;  %v960_v30 = vpop.permute.xlu0 %959 }
  0xaa   : > { %v967_v43 = vunpack.i.h.bf16 %v965_v4  ;;  %v966_v44 = vunpack.i.l.bf16 %v965_v4  ;;  %v962_v45 = vunpack.i.h.bf16 %v960_v30  ;;  %v961_v47 = vunpack.i.l.bf16 %v960_v30 }
  0xac   : > { %v520_v59 = vsel %vm513_vm4, %v511_v48, %v966_v44  ;;  %v521_v60 = vsel %vm513_vm4, %v512_v1, %v967_v43  ;;  %v516_v46 = vsel %vm513_vm4, %v507_v63, %v961_v47  ;;  %v517_v61 = vsel %vm513_vm4, %v508_v5, %v962_v45 }
  0xad   : > { %v975_v36 = vpop.permute.xlu1 %974  ;;  %v970_v6 = vpop.permute.xlu0 %969 }
  0xae   : > { %v977_v49 = vunpack.i.h.bf16 %v975_v36  ;;  %v976_v50 = vunpack.i.l.bf16 %v975_v36  ;;  %v972_v0 = vunpack.i.h.bf16 %v970_v6  ;;  %v971_v51 = vunpack.i.l.bf16 %v970_v6  ;;  %v829_v36 = vld [vmem:[%s1406_s3] ss:$0 sm:$0xff] }
  0xb0   : > { %v529_v10 = vsel %vm522_vm5, %v520_v59, %v976_v50  ;;  %v530_v11 = vsel %vm522_vm5, %v521_v60, %v977_v49  ;;  %v525_v12 = vsel %vm522_vm5, %v516_v46, %v971_v51  ;;  %v526_v13 = vsel %vm522_vm5, %v517_v61, %v972_v0 }
  0xb1   : > { %v985_v9 = vpop.permute.xlu1 %984  ;;  %v980_v42 = vpop.permute.xlu0 %979 }
  0xb2   : > { %v987_v52 = vunpack.i.h.bf16 %v985_v9  ;;  %v986_v8 = vunpack.i.l.bf16 %v985_v9  ;;  %v982_v54 = vunpack.i.h.bf16 %v980_v42  ;;  %v981_v55 = vunpack.i.l.bf16 %v980_v42 }
  0xb4   : > { %v538_v14 = vsel %vm531_vm6, %v529_v10, %v986_v8  ;;  %v539_v15 = vsel %vm531_vm6, %v530_v11, %v987_v52  ;;  %v534_v16 = vsel %vm531_vm6, %v525_v12, %v981_v55  ;;  %v535_v17 = vsel %vm531_vm6, %v526_v13, %v982_v54 }
  0xb5   : > { %v995_v57 = vpop.permute.xlu1 %994  ;;  %v990_v58 = vpop.permute.xlu0 %989 }
  0xb6   : > { %v997_v62 = vunpack.i.h.bf16 %v995_v57  ;;  %v996_v2 = vunpack.i.l.bf16 %v995_v57  ;;  %v992_v3 = vunpack.i.h.bf16 %v990_v58  ;;  %v991_v7 = vunpack.i.l.bf16 %v990_v58 }
  0xb8   : > { %v547_v24 = vsel %vm540_vm7, %v538_v14, %v996_v2  ;;  %v548_v25 = vsel %vm540_vm7, %v539_v15, %v997_v62  ;;  %v543_v26 = vsel %vm540_vm7, %v534_v16, %v991_v7  ;;  %v544_v27 = vsel %vm540_vm7, %v535_v17, %v992_v3 }
  0xb9   : > { %v1005_v18 = vpop.permute.xlu1 %1004  ;;  %v1000_v20 = vpop.permute.xlu0 %999 }
  0xba   : > { %v1007_v21 = vunpack.i.h.bf16 %v1005_v18  ;;  %v1006_v22 = vunpack.i.l.bf16 %v1005_v18  ;;  %v1002_v23 = vunpack.i.h.bf16 %v1000_v20  ;;  %v1001_v53 = vunpack.i.l.bf16 %v1000_v20 }
  0xbc   : > { %v552_v28 = vsel %vm549_vm8, %v543_v26, %v1001_v53  ;;  %v553_v29 = vsel %vm549_vm8, %v544_v27, %v1002_v23  ;;  %v556_v4 = vsel %vm549_vm8, %v547_v24, %v1006_v22  ;;  %v557_v30 = vsel %vm549_vm8, %v548_v25, %v1007_v21 }
  0xbd   : > { %v560_v31 = vpack.c.bf16 %v553_v29, %v552_v28  ;;  %v564_v19 = vpack.c.bf16 %v557_v30, %v556_v4 }
  0xbf   : > { %673 = vmatmul.mubr.bf16.gmra.mxu0 %v560_v31  ;;  %689 = vmatmul.mubr.bf16.gmra.mxu1 %v564_v19 }
 0x163   : > { %v666_v33 = vpop.f32.mrf.mxu0  ;;  %v682_v6 = vpop.f32.mrf.mxu1 }
 0x164   : > { %v704_v39 = vmul.f32 %v828_v32, %v666_v33  ;;  %v708_v41 = vmul.f32 %v828_v32, %v682_v6 }
 0x165   : > { %v668_v37 = vpop.f32.mrf.mxu0  ;;  %v684_v40 = vpop.f32.mrf.mxu1 }
 0x166   : > { %v719_v56 = vadd.f32 %v829_v36, %v704_v39  ;;  %v723_v34 = vadd.f32 %v829_v36, %v708_v41 }
 0x167   : > { %v669_v35 = vpop.f32.mrf.mxu0  ;;  %v685_v38 = vpop.f32.mrf.mxu1 }
 0x168   : > { %v727_v9 = vmax.f32 %v719_v56, 0.0  ;;  %v731_v42 = vmax.f32 %v723_v34, 0.0  ;;  %v705_v43 = vmul.f32 %v828_v32, %v669_v35  ;;  %v709_v44 = vmul.f32 %v828_v32, %v685_v38 }
 0x169   : > { %v671_v45 = vpop.f32.mrf.mxu0  ;;  %v687_v47 = vpop.f32.mrf.mxu1 }
 0x16a   : > { %v735_v48 = vmin.f32 %v727_v9, 20.0  ;;  %v739_v1 = vmin.f32 %v731_v42, 20.0  ;;  %v720_v63 = vadd.f32 %v829_v36, %v705_v43  ;;  %v724_v5 = vadd.f32 %v829_v36, %v709_v44 }
 0x16c   : > { %744 = vst.msk [vmem:[%s1382_s29] sm:$0xff] %vm743_vm9, %v735_v48  ;;  %748 = vst.msk [vmem:[%s1382_s29 + $0x20] sm:$0xff] %vm743_vm9, %v739_v1  ;;  %v728_v49 = vmax.f32 %v720_v63, 0.0  ;;  %v732_v50 = vmax.f32 %v724_v5, 0.0 }
 0x16e   : > { %v736_v0 = vmin.f32 %v728_v49, 20.0  ;;  %v740_v51 = vmin.f32 %v732_v50, 20.0 }
 0x170   : > { %745 = vst.msk [vmem:[%s1382_s29 + $0x8] sm:$0xff] %vm743_vm9, %v736_v0  ;;  %749 = vst.msk [vmem:[%s1382_s29 + $0x28] sm:$0xff] %vm743_vm9, %v740_v51 }
 0x17f   : > { %v674_v52 = vpop.f32.mrf.mxu0  ;;  %v690_v8 = vpop.f32.mrf.mxu1 }
 0x180   : > { %v706_v54 = vmul.f32 %v828_v32, %v674_v52  ;;  %v710_v55 = vmul.f32 %v828_v32, %v690_v8 }
 0x181   : > { %v676_v57 = vpop.f32.mrf.mxu0  ;;  %v692_v58 = vpop.f32.mrf.mxu1 }
 0x182   : > { %v721_v59 = vadd.f32 %v829_v36, %v706_v54  ;;  %v725_v60 = vadd.f32 %v829_v36, %v710_v55 }
 0x183   : > { %v677_v46 = vpop.f32.mrf.mxu0  ;;  %v693_v61 = vpop.f32.mrf.mxu1 }
 0x184   : > { %v729_v62 = vmax.f32 %v721_v59, 0.0  ;;  %v733_v2 = vmax.f32 %v725_v60, 0.0  ;;  %v707_v3 = vmul.f32 %v828_v32, %v677_v46  ;;  %v711_v7 = vmul.f32 %v828_v32, %v693_v61 }
 0x185   : > { %v679_v10 = vpop.f32.mrf.mxu0  ;;  %v695_v11 = vpop.f32.mrf.mxu1 }
 0x186   : > { %v737_v12 = vmin.f32 %v729_v62, 20.0  ;;  %v741_v13 = vmin.f32 %v733_v2, 20.0  ;;  %v722_v14 = vadd.f32 %v829_v36, %v707_v3  ;;  %v726_v15 = vadd.f32 %v829_v36, %v711_v7 }
 0x188   : > { %746 = vst.msk [vmem:[%s1382_s29 + $0x10] sm:$0xff] %vm743_vm9, %v737_v12  ;;  %750 = vst.msk [vmem:[%s1382_s29 + $0x30] sm:$0xff] %vm743_vm9, %v741_v13  ;;  %v730_v16 = vmax.f32 %v722_v14, 0.0  ;;  %v734_v17 = vmax.f32 %v726_v15, 0.0 }
 0x18a   : > { %v738_v18 = vmin.f32 %v730_v16, 20.0  ;;  %v742_v20 = vmin.f32 %v734_v17, 20.0 }
 0x18c   : > { %747 = vst.msk [vmem:[%s1382_s29 + $0x18] sm:$0xff] %vm743_vm9, %v738_v18  ;;  %751 = vst.msk [vmem:[%s1382_s29 + $0x38] sm:$0xff] %vm743_vm9, %v742_v20 }
 0x18d PF: > { %s14_s15 = sadd.s32 1, %s1023_s15  }
 0x18e   : > { %p11_p4 = scmp.ge.s32.totalorder %s14_s15, 4  }
 0x190   :  { %13 = sbr.rel (!%p11_p4) target bundleno = 1 (0x1), region = 66 }

// kernel: conv_res_block_forward.5
= control target key start
LH: loop header
LB: loop body
LE: loop exit
PB: predicated region body
PF: predicated region fallthrough
CT: control target
= control target key end

     0   :  { %s1985_s24 = smov 0   ;;  %s2594_s0 = inlined_call_operand.vmem [shape: f32[2,8,8,8], index: 0, kind: input, shape index: {}]   ;;  %s2595_s1 = inlined_call_operand.vmem [shape: bf16[72,8], index: 1, kind: input, shape index: {}]   ;;  %s2596_s2 = inlined_call_operand.vmem [shape: f32[1,8], index: 2, kind: input, shape index: {}]   ;;  %s2597_s3 = inlined_call_operand.vmem [shape: f32[1,8], index: 3, kind: input, shape index: {}]   ;;  %s2598_s4 = inlined_call_operand.vmem [shape: bf16[72,8], index: 4, kind: input, shape index: {}]   ;;  %s2599_s5 = inlined_call_operand.vmem [shape: f32[1,8], index: 5, kind: input, shape index: {}]   ;;  %s2600_s6 = inlined_call_operand.vmem [shape: f32[1,8], index: 6, kind: input, shape index: {}]   ;;  %s2601_s7 = inlined_call_operand.vmem [shape: f32[2,8,8,8], index: 7, kind: output, shape index: {}]  }
   0x1 LB: > { %s1490_s25 = sadd.s32 4294967295, %s1934_s24   ;;  %p1494_p0 = scmp.ge.s32.totalorder %s1934_s24, 1  ;;  %s1934_s24 = sphi %s1985_s24, %s17_s24  }
   0x2   : > { %p237_p1 = scmp.lt.s32.totalorder %s1934_s24, 3 }
   0x4   : > { %p238_p2 = pnand %p1494_p0, %p237_p1 }
   0x5   : > { %p1995_p3 = scmp.lt.s32.totalorder (!%p238_p2), %s1490_s25, 1  ;;  %s1937_s8 = smov (!%p238_p2), 24  }
   0x6   : > { %241 = sbr.rel (%p238_p2) target bundleno = 811 (0x32b), region = 48  ;;  %s1938_s9 = smov (!%p238_p2), 16  }
   0x7   : > { %s1939_s10 = smov (!%p238_p2), 8   ;;  %s1940_s11 = smov (!%p238_p2), 32  }
   0x8   : > { %s1941_s14 = smov (!%p238_p2), 40   ;;  %s1942_s17 = smov (!%p238_p2), 48  }
   0x9   : > { %s1943_s20 = smov (!%p238_p2), 56   ;;  %s1944_s23 = smov (!%p238_p2), 64  }
   0xb   : > { %vm288_vm0 = vcmask 64512   ;;  %vm290_vm1 = vcmask 58368   ;;  %v1936_v0 = vmov 0.0   ;;  %s2604_s25 = smov (!%p1995_p3, %s1490_s25), 1  ;;  %vm389_vm2 = vcmask 1045504  }
   0xc   : > { %296 = vst.msk [vmem:[#allocation2 + $0x30] sm:$0xff] %vm288_vm0, %v1936_v0  ;;  %298 = vst.msk [vmem:[#allocation2 + $0x40] sm:$0xff] %vm288_vm0, %v1936_v0  ;;  %s1523_s27 = sshll.u32 %s2604_s25, 6  ;;  %vm364_vm3 = vcmask 1046528   ;;  %v1918_v63 = vld [vmem:[%s2595_s1 + $0x20] ss:$0 sps:$4 sm:$0xff]  }
   0xd   : > { %297 = vst.msk [vmem:[#allocation2 + $0x38] sm:$0x3] %vm290_vm1, %v1936_v0  ;;  %299 = vst.msk [vmem:[#allocation2 + $0x48] sm:$0x3] %vm290_vm1, %v1936_v0  ;;  %s273_s30 = scalar_lea.vmem %s2594_s0, %s1523_s27  ;;  %vm737_vm4 = vcmask 1043456   ;;  %vm630_vm5 = vcmask 130048  }
   0xe   : > { %289 = vst.msk [vmem:[#allocation2] sm:$0xff] %vm288_vm0, %v1936_v0  ;;  %292 = vst.msk [vmem:[#allocation2 + $0x10] sm:$0xff] %vm288_vm0, %v1936_v0  ;;  %v2051_v1 = vld [vmem:[%s273_s30 + $0x10] sm:$0xff]  ;;  %v2053_v2 = vld [vmem:[%s273_s30 + $0x18] sm:$0xff]  ;;  %1579 = vmatprep.subr.msk.bf16.mxu0 %vm737_vm4, %v1918_v63  ;;  %vm639_vm6 = vcmask 195584   ;;  %vm648_vm7 = vcmask 261120  }
   0xf   : > { %291 = vst.msk [vmem:[#allocation2 + $0x8] sm:$0x3] %vm290_vm1, %v1936_v0  ;;  %293 = vst.msk [vmem:[#allocation2 + $0x18] sm:$0x3] %vm290_vm1, %v1936_v0  ;;  %v2055_v3 = vld [vmem:[%s273_s30] sm:$0xff]  ;;  %v2061_v4 = vld [vmem:[%s273_s30 + $0x8] sm:$0xff] }
  0x10   : > { %294 = vst.msk [vmem:[#allocation2 + $0x20] sm:$0xff] %vm288_vm0, %v1936_v0  ;;  %300 = vst.msk [vmem:[#allocation2 + $0x50] sm:$0xff] %vm288_vm0, %v1936_v0  ;;  %v2065_v5 = vld [vmem:[%s273_s30 + $0x20] sm:$0xff]  ;;  %v2067_v6 = vld [vmem:[%s273_s30 + $0x28] sm:$0xff]  ;;  %vm657_vm8 = vcmask 326656   ;;  %vm666_vm9 = vcmask 392192  }
  0x11   : > { %295 = vst.msk [vmem:[#allocation2 + $0x28] sm:$0x3] %vm290_vm1, %v1936_v0  ;;  %301 = vst.msk [vmem:[#allocation2 + $0x58] sm:$0x3] %vm290_vm1, %v1936_v0  ;;  %v2075_v9 = vld [vmem:[%s273_s30 + $0x30] sm:$0xff]  ;;  %v2081_v10 = vld [vmem:[%s273_s30 + $0x38] sm:$0xff] }
  0x12   : > { %302 = vst.msk [vmem:[#allocation2 + $0x60] sm:$0xff] %vm288_vm0, %v1936_v0  ;;  %304 = vst.msk [vmem:[#allocation2 + $0x70] sm:$0xff] %vm288_vm0, %v1936_v0  ;;  %vm675_vm10 = vcmask 457728   ;;  %vm684_vm11 = vcmask 523264   ;;  %vm724_vm12 = vcmask 588800  }
  0x13   : > { %303 = vst.msk [vmem:[#allocation2 + $0x68] sm:$0x3] %vm290_vm1, %v1936_v0  ;;  %305 = vst.msk [vmem:[#allocation2 + $0x78] sm:$0x3] %vm290_vm1, %v1936_v0 }
  0x14   : > { %306 = vst.msk [vmem:[#allocation2 + $0x80] sm:$0xff] %vm288_vm0, %v1936_v0  ;;  %308 = vst.msk [vmem:[#allocation2 + $0x90] sm:$0xff] %vm288_vm0, %v1936_v0 }
  0x15   : > { %307 = vst.msk [vmem:[#allocation2 + $0x88] sm:$0x3] %vm290_vm1, %v1936_v0  ;;  %309 = vst.msk [vmem:[#allocation2 + $0x98] sm:$0x3] %vm290_vm1, %v1936_v0  ;;  %v2071_v7 = vld [vmem:[#allocation2] sm:$0xff] }
  0x16   : > { %852 = vst.msk [vmem:[#allocation3] sm:$0xff] %vm288_vm0, %v1936_v0  ;;  %854 = vst.msk [vmem:[#allocation3 + $0x10] sm:$0xff] %vm288_vm0, %v1936_v0  ;;  %v320_v8 = vld [vmem:[#allocation2 + $0x8] sm:$0x3]  ;;  %v390_v11 = vrot.slane %v2071_v7, 2  ;;  %v365_v13 = vrot.slane %v2071_v7, 1 }
  0x17   : > { %853 = vst.msk [vmem:[#allocation3 + $0x8] sm:$0x3] %vm290_vm1, %v1936_v0  ;;  %855 = vst.msk [vmem:[#allocation3 + $0x18] sm:$0x3] %vm290_vm1, %v1936_v0  ;;  %v391_v12 = vrot.slane %v320_v8, 2  ;;  %v366_v14 = vrot.slane %v320_v8, 1 }
  0x18   : > { %856 = vst.msk [vmem:[#allocation3 + $0x20] sm:$0xff] %vm288_vm0, %v1936_v0  ;;  %858 = vst.msk [vmem:[#allocation3 + $0x30] sm:$0xff] %vm288_vm0, %v1936_v0 }
  0x19   : > { %857 = vst.msk [vmem:[#allocation3 + $0x28] sm:$0x3] %vm290_vm1, %v1936_v0  ;;  %859 = vst.msk [vmem:[#allocation3 + $0x38] sm:$0x3] %vm290_vm1, %v1936_v0  ;;  %v392_v18 = vsel %vm389_vm2, %v390_v11, %v391_v12  ;;  %v367_v27 = vsel %vm364_vm3, %v365_v13, %v366_v14  ;;  %v1919_v14 = vld [vmem:[%s2595_s1 + $0x18] sm:$0xff]  }
  0x1a   : > { %860 = vst.msk [vmem:[#allocation3 + $0x40] sm:$0xff] %vm288_vm0, %v1936_v0  ;;  %862 = vst.msk [vmem:[#allocation3 + $0x50] sm:$0xff] %vm288_vm0, %v1936_v0 }
  0x1b   : > { %861 = vst.msk [vmem:[#allocation3 + $0x48] sm:$0x3] %vm290_vm1, %v1936_v0  ;;  %863 = vst.msk [vmem:[#allocation3 + $0x58] sm:$0x3] %vm290_vm1, %v1936_v0 }
  0x1c   : > { %864 = vst.msk [vmem:[#allocation3 + $0x60] sm:$0xff] %vm288_vm0, %v1936_v0  ;;  %866 = vst.msk [vmem:[#allocation3 + $0x70] sm:$0xff] %vm288_vm0, %v1936_v0 }
  0x1d   : > { %865 = vst.msk [vmem:[#allocation3 + $0x68] sm:$0x3] %vm290_vm1, %v1936_v0  ;;  %867 = vst.msk [vmem:[#allocation3 + $0x78] sm:$0x3] %vm290_vm1, %v1936_v0 }
  0x1e   : > { %868 = vst.msk [vmem:[#allocation3 + $0x80] sm:$0xff] %vm288_vm0, %v1936_v0  ;;  %870 = vst.msk [vmem:[#allocation3 + $0x90] sm:$0xff] %vm288_vm0, %v1936_v0 }
  0x1f   : > { %869 = vst.msk [vmem:[#allocation3 + $0x88] sm:$0x3] %vm290_vm1, %v1936_v0  ;;  %871 = vst.msk [vmem:[#allocation3 + $0x98] sm:$0x3] %vm290_vm1, %v1936_v0 }
  0x20   : > { %313 = vst.msk [vmem:[#allocation2 + $0x31] sm:$0xff] %vm288_vm0, %v2051_v1  ;;  %314 = vst.msk [vmem:[#allocation2 + $0x41] sm:$0xff] %vm288_vm0, %v2053_v2 }
  0x21   : > { %311 = vst.msk [vmem:[#allocation2 + $0x11] sm:$0xff] %vm288_vm0, %v2055_v3  ;;  %312 = vst.msk [vmem:[#allocation2 + $0x21] sm:$0xff] %vm288_vm0, %v2061_v4 }
  0x22   : > { %315 = vst.msk [vmem:[#allocation2 + $0x51] sm:$0xff] %vm288_vm0, %v2065_v5  ;;  %316 = vst.msk [vmem:[#allocation2 + $0x61] sm:$0xff] %vm288_vm0, %v2067_v6 }
  0x23   : > { %317 = vst.msk [vmem:[#allocation2 + $0x71] sm:$0xff] %vm288_vm0, %v2075_v9  ;;  %318 = vst.msk [vmem:[#allocation2 + $0x81] sm:$0xff] %vm288_vm0, %v2081_v10 }
  0x27   : > { %v2087_v15 = vld [vmem:[#allocation2 + $0x30] sm:$0xff]  ;;  %v2089_v16 = vld [vmem:[#allocation2 + $0x40] sm:$0xff]  ;;  %v326_v30 = vld [vmem:[#allocation2 + $0x38] sm:$0x3] }
  0x28   : > { %v2091_v17 = vld [vmem:[#allocation2 + $0x10] sm:$0xff]  ;;  %v1603_v19 = vpack.i.bf16 %v2089_v16, %v2087_v15  ;;  %v2096_v20 = vld [vmem:[#allocation2 + $0x20] sm:$0xff]  ;;  %v322_v21 = vld [vmem:[#allocation2 + $0x18] sm:$0x3]  ;;  %v399_v24 = vrot.slane %v2087_v15, 2  ;;  %v400_v33 = vrot.slane %v326_v30, 2 }
  0x29   : > { %v393_v22 = vrot.slane %v2091_v17, 2  ;;  %v368_v23 = vrot.slane %v2091_v17, 1  ;;  %v1598_v25 = vpack.i.bf16 %v2096_v20, %v2091_v17  ;;  %v394_v26 = vrot.slane %v322_v21, 2  ;;  %v324_v29 = vld [vmem:[#allocation2 + $0x28] sm:$0x3]  ;;  %v2126_v57 = vld [vmem:[#allocation2 + $0x50] sm:$0xff] }
  0x2a   : > { %v369_v28 = vrot.slane %v322_v21, 1  ;;  %1604 = vrot.lane.b32.xlu1 %v1603_v19, %s1937_s8  ;;  %v396_v31 = vrot.slane %v2096_v20, 2  ;;  %v397_v32 = vrot.slane %v324_v29, 2  ;;  %v371_v34 = vrot.slane %v2096_v20, 1  ;;  %v328_v39 = vld [vmem:[#allocation2 + $0x48] sm:$0x3] }
  0x2b   : > { %1599 = vrot.lane.b32.xlu0 %v1598_v25, %s1937_s8  ;;  %v395_v35 = vsel %vm389_vm2, %v393_v22, %v394_v26  ;;  %v372_v37 = vrot.slane %v324_v29, 1  ;;  %v374_v38 = vrot.slane %v2087_v15, 1  ;;  %v401_v43 = vsel %vm389_vm2, %v399_v24, %v400_v33  ;;  %v330_v58 = vld [vmem:[#allocation2 + $0x58] sm:$0x3]  ;;  %v2143_v12 = vld [vmem:[#allocation2 + $0x60] sm:$0xff] }
  0x2c   : > { %v370_v36 = vsel %vm364_vm3, %v368_v23, %v369_v28  ;;  %v1618_v40 = vpack.i.bf16 %v395_v35, %v392_v18  ;;  %v398_v42 = vsel %vm389_vm2, %v396_v31, %v397_v32  ;;  %v375_v45 = vrot.slane %v326_v30, 1  ;;  %v332_v13 = vld [vmem:[#allocation2 + $0x68] sm:$0x3]  ;;  %v2148_v18 = vld [vmem:[#allocation2 + $0x70] sm:$0xff]  ;;  %v334_v19 = vld [vmem:[#allocation2 + $0x78] sm:$0x3] }
  0x2d   : > { %v1608_v41 = vpack.i.bf16 %v370_v36, %v367_v27  ;;  %v373_v44 = vsel %vm364_vm3, %v371_v34, %v372_v37  ;;  %v377_v46 = vrot.slane %v2089_v16, 1  ;;  %v2116_v47 = vpack.i.bf16 %v401_v43, %v398_v42  ;;  %v1920_v27 = vld [vmem:[%s2595_s1 + $0x10] sm:$0xff]  }
  0x2e   : > { %1619 = vrot.lane.b32.xlu1 %v1618_v40, %s1938_s9  ;;  %v378_v48 = vrot.slane %v328_v39, 1  ;;  %v376_v49 = vsel %vm364_vm3, %v374_v38, %v375_v45  ;;  %v402_v50 = vrot.slane %v2089_v16, 2  ;;  %v403_v51 = vrot.slane %v328_v39, 2 }
  0x2f   : > { %1609 = vrot.lane.b32.xlu0 %v1608_v41, %s1939_s10  ;;  %v1613_v52 = vpack.i.bf16 %v376_v49, %v373_v44  ;;  %v1628_v55 = vpack.i.bf16 %v373_v44, %v370_v36  ;;  %v1638_v60 = vpack.i.bf16 %v398_v42, %v395_v35  ;;  %v380_v61 = vrot.slane %v2126_v57, 1  ;;  %v1921_v36 = vld [vmem:[%s2595_s1 + $0x8] sm:$0xff]   ;;  %v1922_v42 = vld [vmem:[%s2595_s1] sm:$0xff]  }
  0x30   : > { %v379_v53 = vsel %vm364_vm3, %v377_v46, %v378_v48  ;;  %v404_v56 = vsel %vm389_vm2, %v402_v50, %v403_v51  ;;  %v381_v62 = vrot.slane %v330_v58, 1  ;;  %v1653_v0 = vpack.i.bf16 %v2126_v57, %v2089_v16  ;;  %v336_v44 = vld [vmem:[#allocation2 + $0x88] sm:$0x3] }
  0x31   : > { %v1633_v54 = vpack.i.bf16 %v379_v53, %v376_v49  ;;  %v1648_v59 = vpack.i.bf16 %v404_v56, %v401_v43  ;;  %v1643_v8 = vpack.i.bf16 %v2087_v15, %v2096_v20  ;;  %v739_v21 = vsel %vm737_vm4, %v1918_v63, 0  ;;  %v335_v43 = vld [vmem:[#allocation2 + $0x80] sm:$0xff] }
  0x32   : > { %1624 = vrot.lane.b32.xlu1 %v2116_v47, %s1938_s9  ;;  %v2141_v11 = vsel %vm364_vm3, %v380_v61, %v381_v62  ;;  %v383_v23 = vrot.slane %v2143_v12, 1  ;;  %v384_v24 = vrot.slane %v332_v13, 1  ;;  %1544 = vmatpush3.bf16.msra.mxu0 %v739_v21  ;;  %v386_v25 = vrot.slane %v2148_v18, 1 }
  0x33   : > { %1614 = vrot.lane.b32.xlu0 %v1613_v52, %s1939_s10  ;;  %v1663_v22 = vpack.i.bf16 %v2141_v11, %v379_v53  ;;  %v387_v26 = vrot.slane %v334_v19, 1  ;;  %1545 = vmatprep.subr.bf16.mxu0 %v1919_v14  ;;  %v405_v28 = vrot.slane %v2126_v57, 2  ;;  %v406_v29 = vrot.slane %v330_v58, 2  ;;  %v338_v58 = vld [vmem:[#allocation2 + $0x98] sm:$0x3] }
  0x34   : > { %v385_v30 = vsel %vm364_vm3, %v383_v23, %v384_v24  ;;  %v408_v31 = vrot.slane %v2143_v12, 2  ;;  %v409_v33 = vrot.slane %v332_v13, 2  ;;  %v411_v34 = vrot.slane %v2148_v18, 2 }
  0x35   : > { %v388_v32 = vsel %vm364_vm3, %v386_v25, %v387_v26  ;;  %v412_v35 = vrot.slane %v334_v19, 2  ;;  %v407_v37 = vsel %vm389_vm2, %v405_v28, %v406_v29  ;;  %v416_v46 = vrot.slane %v335_v43, 1 }
  0x36   : > { %1634 = vrot.lane.b32.xlu1 %v1633_v54, %s1940_s11  ;;  %1546 = vmatpush3.bf16.msra.mxu0 %v1919_v14  ;;  %v1683_v38 = vpack.i.bf16 %v388_v32, %v385_v30  ;;  %v1678_v39 = vpack.i.bf16 %v407_v37, %v404_v56  ;;  %v410_v40 = vsel %vm389_vm2, %v408_v31, %v409_v33  ;;  %v419_v51 = vrot.slane %v335_v43, 2  ;;  %v337_v56 = vld [vmem:[#allocation2 + $0x90] sm:$0xff] }
  0x37   : > { %1629 = vrot.lane.b32.xlu0 %v1628_v55, %s1940_s11  ;;  %1547 = vmatprep.subr.bf16.mxu0 %v1920_v27  ;;  %v413_v41 = vsel %vm389_vm2, %v411_v34, %v412_v35  ;;  %v1703_v48 = vpack.i.bf16 %v335_v43, %v2148_v18  ;;  %v1698_v49 = vpack.i.bf16 %v2143_v12, %v2126_v57  ;;  %v424_v61 = vrot.slane %v337_v56, 1 }
  0x38   : > { %v1693_v45 = vpack.i.bf16 %v413_v41, %v410_v40  ;;  %v1708_v54 = vpack.i.bf16 %v385_v30, %v2141_v11  ;;  %v425_v62 = vrot.slane %v338_v58, 1  ;;  %v1733_v63 = vpack.i.bf16 %v337_v56, %v335_v43 }
  0x39   : > { %v428_v13 = vrot.slane %v338_v58, 2 }
  0x3a   : > { %1649 = vrot.lane.b32.xlu1 %v1648_v59, %s1941_s14  ;;  %1548 = vmatpush3.bf16.msra.mxu0 %v1920_v27  ;;  %v426_v11 = vsel %vm364_vm3, %v424_v61, %v425_v62 }
  0x3b   : > { %1639 = vrot.lane.b32.xlu0 %v1638_v60, %s1941_s14  ;;  %1549 = vmatprep.subr.bf16.mxu0 %v1921_v36  ;;  %v1718_v60 = vpack.i.bf16 %v410_v40, %v407_v37 }
  0x3e   : > { %1654 = vrot.lane.b32.xlu1 %v1653_v0, %s1942_s17  ;;  %1550 = vmatpush3.bf16.msra.mxu0 %v1921_v36  ;;  %v427_v0 = vrot.slane %v337_v56, 2 }
  0x3f   : > { %1644 = vrot.lane.b32.xlu0 %v1643_v8, %s1942_s17  ;;  %1551 = vmatprep.subr.bf16.mxu0 %v1922_v42  ;;  %v1728_v8 = vpack.i.bf16 %v2148_v18, %v2143_v12 }
  0x40   : > { %v429_v19 = vsel %vm389_vm2, %v427_v0, %v428_v13 }
  0x42   : > { %1664 = vrot.lane.b32.xlu1 %v1663_v22, %s1943_s20  ;;  %1552 = vmatpush3.bf16.msra.mxu0 %v1922_v42 }
  0x43   : > { %1659 = vrot.lane.b32.xlu0 %v1613_v52, %s1943_s20  ;;  %v420_v52 = vrot.slane %v336_v44, 2 }
  0x45   : > { %v421_v55 = vsel %vm389_vm2, %v419_v51, %v420_v52 }
  0x46   : > { %1674 = vrot.lane.b32.xlu1 %v1663_v22, %s1939_s10  ;;  %v1723_v59 = vpack.i.bf16 %v421_v55, %v413_v41  ;;  %v1753_v21 = vpack.i.bf16 %v429_v19, %v421_v55 }
  0x47   : > { %1669 = vrot.lane.b32.xlu0 %v2116_v47, %s1944_s23  ;;  %v417_v47 = vrot.slane %v336_v44, 1 }
  0x49   : > { %v418_v50 = vsel %vm364_vm3, %v416_v46, %v417_v47 }
  0x4a   : > { %1684 = vrot.lane.b32.xlu1 %v1683_v38, %s1939_s10  ;;  %v1713_v53 = vpack.i.bf16 %v418_v50, %v388_v32  ;;  %v1743_v14 = vpack.i.bf16 %v426_v11, %v418_v50 }
  0x4b   : > { %1679 = vrot.lane.b32.xlu0 %v1678_v39, %s1944_s23 }
  0x4e   : > { %1694 = vrot.lane.b32.xlu1 %v1693_v45, %s1938_s9 }
  0x4f   : > { %1689 = vrot.lane.b32.xlu0 %v1678_v39, %s1938_s9 }
  0x52   : > { %1704 = vrot.lane.b32.xlu1 %v1703_v48, %s1937_s8 }
  0x53   : > { %1699 = vrot.lane.b32.xlu0 %v1698_v49, %s1937_s8 }
  0x56   : > { %1714 = vrot.lane.b32.xlu1 %v1713_v53, %s1940_s11 }
  0x57   : > { %1709 = vrot.lane.b32.xlu0 %v1708_v54, %s1940_s11 }
  0x5a   : > { %1724 = vrot.lane.b32.xlu1 %v1723_v59, %s1941_s14 }
  0x5b   : > { %1719 = vrot.lane.b32.xlu0 %v1718_v60, %s1941_s14 }
  0x5e   : > { %1734 = vrot.lane.b32.xlu1 %v1733_v63, %s1942_s17 }
  0x5f   : > { %1729 = vrot.lane.b32.xlu0 %v1728_v8, %s1942_s17 }
  0x62   : > { %1744 = vrot.lane.b32.xlu1 %v1743_v14, %s1943_s20 }
  0x63   : > { %1739 = vrot.lane.b32.xlu0 %v1683_v38, %s1943_s20 }
  0x66   : > { %1754 = vrot.lane.b32.xlu1 %v1753_v21, %s1944_s23 }
  0x67   : > { %1749 = vrot.lane.b32.xlu0 %v1693_v45, %s1944_s23 }
  0x9c   : > { %v1605_v22 = vpop.permute.xlu1 %1604 }
  0x9d   : > { %v1600_v23 = vpop.permute.xlu0 %1599  ;;  %v1606_v47 = vunpack.i.l.bf16 %v1605_v22 }
  0x9e   : > { %v1602_v48 = vunpack.i.h.bf16 %v1600_v23  ;;  %v1601_v49 = vunpack.i.l.bf16 %v1600_v23 }
  0xa0   : > { %v1620_v24 = vpop.permute.xlu1 %1619 }
  0xa1   : > { %v1610_v25 = vpop.permute.xlu0 %1609  ;;  %v1622_v36 = vunpack.i.h.bf16 %v1620_v24  ;;  %v1621_v37 = vunpack.i.l.bf16 %v1620_v24 }
  0xa2   : > { %v1612_v30 = vunpack.i.h.bf16 %v1610_v25  ;;  %v1611_v31 = vunpack.i.l.bf16 %v1610_v25 }
  0xa4   : > { %v1625_v26 = vpop.permute.xlu1 %1624  ;;  %v623_v38 = vsel %vm288_vm0, %v2091_v17, %v1612_v30  ;;  %v622_v39 = vsel %vm288_vm0, %v2071_v7, %v1611_v31  ;;  %v1607_v7 = vunpack.i.h.bf16 %v1605_v22 }
  0xa5   : > { %v1615_v27 = vpop.permute.xlu0 %1614  ;;  %v1627_v40 = vunpack.i.h.bf16 %v1625_v26  ;;  %v1626_v41 = vunpack.i.l.bf16 %v1625_v26  ;;  %v632_v17 = vsel %vm630_vm5, %v623_v38, %v1622_v36  ;;  %v631_v46 = vsel %vm630_vm5, %v622_v39, %v1621_v37 }
  0xa6   : > { %v1617_v33 = vunpack.i.h.bf16 %v1615_v27  ;;  %v1616_v34 = vunpack.i.l.bf16 %v1615_v27  ;;  %v640_v53 = vsel %vm639_vm6, %v631_v46, %v1601_v49  ;;  %v641_v54 = vsel %vm639_vm6, %v632_v17, %v1602_v48 }
  0xa8   : > { %v2205_v28 = vpop.permute.xlu1 %1634  ;;  %v625_v43 = vsel %vm288_vm0, %v2087_v15, %v1617_v33  ;;  %v624_v44 = vsel %vm288_vm0, %v2096_v20, %v1616_v34 }
  0xa9   : > { %v1630_v29 = vpop.permute.xlu0 %1629  ;;  %v634_v50 = vsel %vm630_vm5, %v625_v43, %v1627_v40  ;;  %v633_v15 = vsel %vm630_vm5, %v624_v44, %v1626_v41  ;;  %v1637_v59 = vunpack.i.h.bf16 %v2205_v28  ;;  %v1636_v60 = vunpack.i.l.bf16 %v2205_v28 }
  0xaa   : > { %v1632_v51 = vunpack.i.h.bf16 %v1630_v29  ;;  %v1631_v52 = vunpack.i.l.bf16 %v1630_v29  ;;  %v642_v63 = vsel %vm639_vm6, %v633_v15, %v1606_v47  ;;  %v643_v0 = vsel %vm639_vm6, %v634_v50, %v1607_v7 }
  0xab   : > { %v651_v36 = vsel %vm648_vm7, %v642_v63, %v1636_v60  ;;  %v652_v37 = vsel %vm648_vm7, %v643_v0, %v1637_v59 }
  0xac   : > { %v2207_v32 = vpop.permute.xlu1 %1649  ;;  %v649_v13 = vsel %vm648_vm7, %v640_v53, %v1631_v52  ;;  %v650_v14 = vsel %vm648_vm7, %v641_v54, %v1632_v51 }
  0xad   : > { %v1640_v35 = vpop.permute.xlu0 %1639  ;;  %v1652_v19 = vunpack.i.h.bf16 %v2207_v32  ;;  %v1651_v21 = vunpack.i.l.bf16 %v2207_v32 }
  0xae   : > { %v1642_v55 = vunpack.i.h.bf16 %v1640_v35  ;;  %v1641_v56 = vunpack.i.l.bf16 %v1640_v35 }
  0xaf   : > { %v660_v41 = vsel %vm657_vm8, %v651_v36, %v1651_v21 }
  0xb0   : > { %v2213_v42 = vpop.permute.xlu1 %1654  ;;  %v658_v23 = vsel %vm657_vm8, %v649_v13, %v1641_v56  ;;  %v659_v24 = vsel %vm657_vm8, %v650_v14, %v1642_v55 }
  0xb1   : > { %v1645_v45 = vpop.permute.xlu0 %1644  ;;  %v1657_v25 = vunpack.i.h.bf16 %v2213_v42  ;;  %v1656_v26 = vunpack.i.l.bf16 %v2213_v42  ;;  %v661_v42 = vsel %vm657_vm8, %v652_v37, %v1652_v19 }
  0xb2   : > { %v1647_v61 = vunpack.i.h.bf16 %v1645_v45  ;;  %v1646_v62 = vunpack.i.l.bf16 %v1645_v45 }
  0xb3   : > { %v669_v45 = vsel %vm666_vm9, %v660_v41, %v1656_v26  ;;  %v670_v17 = vsel %vm666_vm9, %v661_v42, %v1657_v25 }
  0xb4   : > { %v1665_v20 = vpop.permute.xlu1 %1664  ;;  %v667_v28 = vsel %vm666_vm9, %v658_v23, %v1646_v62  ;;  %v668_v29 = vsel %vm666_vm9, %v659_v24, %v1647_v61 }
  0xb5   : > { %v1660_v58 = vpop.permute.xlu0 %1659  ;;  %v1667_v33 = vunpack.i.h.bf16 %v1665_v20  ;;  %v1666_v34 = vunpack.i.l.bf16 %v1665_v20 }
  0xb6   : > { %v1662_v8 = vunpack.i.h.bf16 %v1660_v58  ;;  %v1661_v11 = vunpack.i.l.bf16 %v1660_v58 }
  0xb7   : > { %v678_v47 = vsel %vm675_vm10, %v669_v45, %v1666_v34  ;;  %v679_v48 = vsel %vm675_vm10, %v670_v17, %v1667_v33 }
  0xb8   : > { %v1675_v22 = vpop.permute.xlu1 %1674  ;;  %v676_v32 = vsel %vm675_vm10, %v667_v28, %v1661_v11  ;;  %v677_v35 = vsel %vm675_vm10, %v668_v29, %v1662_v8 }
  0xb9   : > { %v1670_v27 = vpop.permute.xlu0 %1669  ;;  %v1677_v59 = vunpack.i.h.bf16 %v1675_v22  ;;  %v1676_v60 = vunpack.i.l.bf16 %v1675_v22 }
  0xba   : > { %v1672_v30 = vunpack.i.h.bf16 %v1670_v27  ;;  %v1671_v31 = vunpack.i.l.bf16 %v1670_v27 }
  0xbb   : > { %v627_v25 = vsel %vm288_vm0, %v2126_v57, %v1677_v59  ;;  %v626_v22 = vsel %vm288_vm0, %v2089_v16, %v1676_v60 }
  0xbc   : > { %v1685_v38 = vpop.permute.xlu1 %1684  ;;  %v685_v39 = vsel %vm684_vm11, %v676_v32, %v1671_v31  ;;  %v686_v40 = vsel %vm684_vm11, %v677_v35, %v1672_v30 }
  0xbd   : > { %v1680_v43 = vpop.permute.xlu0 %1679  ;;  %v693_v44 = vpack.c.bf16 %v686_v40, %v685_v39  ;;  %v1687_v56 = vunpack.i.h.bf16 %v1685_v38  ;;  %v1686_v58 = vunpack.i.l.bf16 %v1685_v38 }
  0xbe   : > { %v1682_v46 = vunpack.i.h.bf16 %v1680_v43  ;;  %v1681_v7 = vunpack.i.l.bf16 %v1680_v43 }
  0xbf   : > { %1553 = vmatprep.mubr.msk.bf16.mxu0 %vm724_vm12, %v693_v44  ;;  %v629_v19 = vsel %vm288_vm0, %v2148_v18, %v1687_v56  ;;  %v628_v21 = vsel %vm288_vm0, %v2143_v12, %v1686_v58 }
  0xc0   : > { %v687_v49 = vsel %vm684_vm11, %v678_v47, %v1681_v7  ;;  %v688_v50 = vsel %vm684_vm11, %v679_v48, %v1682_v46  ;;  %v1695_v15 = vpop.permute.xlu1 %1694 }
  0xc1   : > { %v694_v51 = vpack.c.bf16 %v688_v50, %v687_v49  ;;  %v1690_v52 = vpop.permute.xlu0 %1689  ;;  %v1697_v61 = vunpack.i.h.bf16 %v1695_v15  ;;  %v1696_v62 = vunpack.i.l.bf16 %v1695_v15 }
  0xc2   : > { %v1692_v0 = vunpack.i.h.bf16 %v1690_v52  ;;  %v1691_v8 = vunpack.i.l.bf16 %v1690_v52 }
  0xc3   : > { %1554 = vmatmul.mubr.msk.bf16.vlgmr.msra.gmra.mxu0 %vm724_vm12, %v694_v51  ;;  %v637_v26 = vsel %vm630_vm5, %v628_v21, %v1696_v62  ;;  %v638_v27 = vsel %vm630_vm5, %v629_v19, %v1697_v61 }
  0xc4   : > { %v1705_v20 = vpop.permute.xlu1 %1704  ;;  %v636_v29 = vsel %vm630_vm5, %v627_v25, %v1692_v0  ;;  %v635_v18 = vsel %vm630_vm5, %v626_v22, %v1691_v8 }
  0xc5   : > { %v1700_v53 = vpop.permute.xlu0 %1699  ;;  %v1707_v13 = vunpack.i.h.bf16 %v1705_v20  ;;  %v1706_v14 = vunpack.i.l.bf16 %v1705_v20 }
  0xc6   : > { %v1702_v23 = vunpack.i.h.bf16 %v1700_v53  ;;  %v1701_v24 = vunpack.i.l.bf16 %v1700_v53 }
  0xc7   : > { %v646_v33 = vsel %vm639_vm6, %v637_v26, %v1706_v14  ;;  %v647_v34 = vsel %vm639_vm6, %v638_v27, %v1707_v13  ;;  %v2296_v26 = vld [vmem:[%s2596_s2] ss:$0 sm:$0xff] }
  0xc8   : > { %v1715_v54 = vpop.permute.xlu1 %1714  ;;  %v644_v16 = vsel %vm639_vm6, %v635_v18, %v1701_v24  ;;  %v645_v35 = vsel %vm639_vm6, %v636_v29, %v1702_v23 }
  0xc9   : > { %v1710_v55 = vpop.permute.xlu0 %1709  ;;  %v1717_v30 = vunpack.i.h.bf16 %v1715_v54  ;;  %v1716_v31 = vunpack.i.l.bf16 %v1715_v54 }
  0xca   : > { %v1712_v57 = vunpack.i.h.bf16 %v1710_v55  ;;  %v1711_v32 = vunpack.i.l.bf16 %v1710_v55 }
  0xcb   : > { %v655_v43 = vsel %vm648_vm7, %v646_v33, %v1716_v31  ;;  %v656_v44 = vsel %vm648_vm7, %v647_v34, %v1717_v30 }
  0xcc   : > { %v1725_v63 = vpop.permute.xlu1 %1724  ;;  %v653_v7 = vsel %vm648_vm7, %v644_v16, %v1711_v32  ;;  %v654_v47 = vsel %vm648_vm7, %v645_v35, %v1712_v57 }
  0xcd   : > { %v1720_v11 = vpop.permute.xlu0 %1719  ;;  %v1727_v36 = vunpack.i.h.bf16 %v1725_v63  ;;  %v1726_v37 = vunpack.i.l.bf16 %v1725_v63 }
  0xce   : > { %v1722_v38 = vunpack.i.h.bf16 %v1720_v11  ;;  %v1721_v39 = vunpack.i.l.bf16 %v1720_v11 }
  0xcf   : > { %v664_v50 = vsel %vm657_vm8, %v655_v43, %v1726_v37  ;;  %v665_v15 = vsel %vm657_vm8, %v656_v44, %v1727_v36  ;;  %v2313_v43 = vld [vmem:[#allocation3] sm:$0xff]  ;;  %v882_v44 = vld [vmem:[#allocation3 + $0x8] sm:$0x3] }
  0xd0   : > { %v1735_v28 = vpop.permute.xlu1 %1734  ;;  %v662_v20 = vsel %vm657_vm8, %v653_v7, %v1721_v39  ;;  %v663_v53 = vsel %vm657_vm8, %v654_v47, %v1722_v38 }
  0xd1   : > { %v1730_v12 = vpop.permute.xlu0 %1729  ;;  %v1737_v40 = vunpack.i.h.bf16 %v1735_v28  ;;  %v1736_v41 = vunpack.i.l.bf16 %v1735_v28  ;;  %v2301_v28 = vld [vmem:[%s2597_s3] ss:$0 sm:$0xff] }
  0xd2   : > { %v1732_v45 = vunpack.i.h.bf16 %v1730_v12  ;;  %v1731_v17 = vunpack.i.l.bf16 %v1730_v12 }
  0xd3   : > { %v673_v54 = vsel %vm666_vm9, %v664_v50, %v1736_v41  ;;  %v674_v55 = vsel %vm666_vm9, %v665_v15, %v1737_v40 }
  0xd4   : > { %v1745_v42 = vpop.permute.xlu1 %1744  ;;  %v671_v58 = vsel %vm666_vm9, %v662_v20, %v1731_v17  ;;  %v672_v59 = vsel %vm666_vm9, %v663_v53, %v1732_v45  ;;  %v926_v17 = vrot.slane %v2313_v43, 1 }
  0xd5   : > { %v1740_v46 = vpop.permute.xlu0 %1739  ;;  %v1747_v48 = vunpack.i.h.bf16 %v1745_v42  ;;  %v1746_v49 = vunpack.i.l.bf16 %v1745_v42 }
  0xd6   : > { %v1742_v51 = vunpack.i.h.bf16 %v1740_v46  ;;  %v1741_v52 = vunpack.i.l.bf16 %v1740_v46  ;;  %v927_v46 = vrot.slane %v882_v44, 1 }
  0xd7   : > { %v682_v63 = vsel %vm675_vm10, %v673_v54, %v1746_v49  ;;  %v683_v0 = vsel %vm675_vm10, %v674_v55, %v1747_v48 }
  0xd8   : > { %v1755_v56 = vpop.permute.xlu1 %1754  ;;  %v680_v13 = vsel %vm675_vm10, %v671_v58, %v1741_v52  ;;  %v681_v14 = vsel %vm675_vm10, %v672_v59, %v1742_v51  ;;  %v928_v50 = vsel %vm364_vm3, %v926_v17, %v927_v46  ;;  %v950_v51 = vrot.slane %v2313_v43, 2 }
  0xd9   : > { %v1757_v60 = vunpack.i.h.bf16 %v1755_v56  ;;  %v1756_v61 = vunpack.i.l.bf16 %v1755_v56  ;;  %v1750_v62 = vpop.permute.xlu0 %1749  ;;  %v951_v52 = vrot.slane %v882_v44, 2 }
  0xda   : > { %v1752_v8 = vunpack.i.h.bf16 %v1750_v62  ;;  %v1751_v11 = vunpack.i.l.bf16 %v1750_v62 }
  0xdb   : > { %v691_v19 = vsel %vm684_vm11, %v682_v63, %v1756_v61  ;;  %v692_v21 = vsel %vm684_vm11, %v683_v0, %v1757_v60 }
  0xdc   : > { %v696_v23 = vpack.c.bf16 %v692_v21, %v691_v19  ;;  %v689_v24 = vsel %vm684_vm11, %v680_v13, %v1751_v11  ;;  %v690_v25 = vsel %vm684_vm11, %v681_v14, %v1752_v8  ;;  %v952_v19 = vsel %vm389_vm2, %v950_v51, %v951_v52 }
  0xdd   : > { %v695_v22 = vpack.c.bf16 %v690_v25, %v689_v24 }
  0xdf   : > { %1557 = vmatprep.mubr.msk.bf16.mxu0 %vm724_vm12, %v695_v22 }
  0xe0   : > { %1558 = vmatmul.mubr.msk.bf16.gmra.mxu0 %vm724_vm12, %v696_v23 }
 0x183   : > { %v1555_v27 = vpop.f32.mrf.mxu0 }
 0x184   : > { %v815_v29 = vmul.f32 %v1555_v27, %v2296_v26 }
 0x185   : > { %v775_v18 = vpop.f32.mrf.mxu0 }
 0x186   : > { %v830_v30 = vadd.f32 %v2301_v28, %v815_v29  ;;  %v813_v31 = vmul.f32 %v2296_v26, %v775_v18 }
 0x187   : > { %v1556_v12 = vpop.f32.mrf.mxu0 }
 0x188   : > { %v838_v33 = vmax.f32 %v830_v30, 0.0  ;;  %v828_v34 = vadd.f32 %v2301_v28, %v813_v31  ;;  %v816_v57 = vmul.f32 %v1556_v12, %v2296_v26 }
 0x189   : > { %v778_v32 = vpop.f32.mrf.mxu0 }
 0x18a   : > { %v846_v16 = vmin.f32 %v838_v33, 20.0  ;;  %v836_v35 = vmax.f32 %v828_v34, 0.0  ;;  %v831_v36 = vadd.f32 %v2301_v28, %v816_v57  ;;  %v814_v37 = vmul.f32 %v2296_v26, %v778_v32 }
 0x18c   : > { %875 = vst.msk [vmem:[#allocation3 + $0x31] sm:$0xff] %vm288_vm0, %v846_v16  ;;  %v844_v38 = vmin.f32 %v836_v35, 20.0  ;;  %v839_v39 = vmax.f32 %v831_v36, 0.0  ;;  %v829_v40 = vadd.f32 %v2301_v28, %v814_v37 }
 0x18e   : > { %873 = vst.msk [vmem:[#allocation3 + $0x11] sm:$0xff] %vm288_vm0, %v844_v38  ;;  %v847_v41 = vmin.f32 %v839_v39, 20.0  ;;  %v837_v42 = vmax.f32 %v829_v40, 0.0 }
 0x190   : > { %876 = vst.msk [vmem:[#allocation3 + $0x41] sm:$0xff] %vm288_vm0, %v847_v41  ;;  %v845_v45 = vmin.f32 %v837_v42, 20.0 }
 0x192   : > { %874 = vst.msk [vmem:[#allocation3 + $0x21] sm:$0xff] %vm288_vm0, %v845_v45 }
 0x193   : > { %v2318_v7 = vld [vmem:[#allocation3 + $0x30] sm:$0xff]  ;;  %v888_v47 = vld [vmem:[#allocation3 + $0x38] sm:$0x3] }
 0x194   : > { %v935_v15 = vrot.slane %v2318_v7, 1  ;;  %v936_v54 = vrot.slane %v888_v47, 1  ;;  %v959_v22 = vrot.slane %v2318_v7, 2  ;;  %v960_v27 = vrot.slane %v888_v47, 2 }
 0x195   : > { %v2320_v48 = vld [vmem:[#allocation3 + $0x10] sm:$0xff]  ;;  %v884_v49 = vld [vmem:[#allocation3 + $0x18] sm:$0x3] }
 0x196   : > { %v929_v20 = vrot.slane %v2320_v48, 1  ;;  %v930_v53 = vrot.slane %v884_v49, 1  ;;  %v953_v55 = vrot.slane %v2320_v48, 2  ;;  %v954_v59 = vrot.slane %v884_v49, 2  ;;  %v1923_v49 = vld [vmem:[%s2598_s4 + $0x20] ss:$0 sps:$4 sm:$0xff]  }
 0x197   : > { %v2327_v56 = vld [vmem:[#allocation3 + $0x40] sm:$0xff]  ;;  %v890_v58 = vld [vmem:[#allocation3 + $0x48] sm:$0x3]  ;;  %v937_v13 = vsel %vm364_vm3, %v935_v15, %v936_v54  ;;  %v961_v12 = vsel %vm389_vm2, %v959_v22, %v960_v27  ;;  %1580 = vmatprep.subr.msk.bf16.mxu1 %vm737_vm4, %v1923_v49 }
 0x198   : > { %v1758_v60 = vpack.i.bf16 %v2327_v56, %v2318_v7  ;;  %v2332_v61 = vsel %vm364_vm3, %v929_v20, %v930_v53  ;;  %v938_v62 = vrot.slane %v2327_v56, 1  ;;  %v939_v63 = vrot.slane %v890_v58, 1  ;;  %v1927_v27 = vld [vmem:[%s2598_s4] sm:$0xff]  }
 0x199   : > { %v1763_v0 = vpack.i.bf16 %v2332_v61, %v928_v50  ;;  %v962_v8 = vrot.slane %v2327_v56, 2  ;;  %v963_v11 = vrot.slane %v890_v58, 2  ;;  %v2344_v21 = vsel %vm389_vm2, %v953_v55, %v954_v59  ;;  %v2346_v23 = vld [vmem:[#allocation3 + $0x20] sm:$0xff]  ;;  %v886_v24 = vld [vmem:[#allocation3 + $0x28] sm:$0x3] }
 0x19a   : > { %1759 = vrot.lane.b32.xlu1 %v1758_v60, %s1937_s8  ;;  %v2340_v14 = vsel %vm364_vm3, %v938_v62, %v939_v63  ;;  %v1768_v29 = vpack.i.bf16 %v2344_v21, %v952_v19  ;;  %v932_v30 = vrot.slane %v2346_v23, 1  ;;  %v933_v31 = vrot.slane %v886_v24, 1 }
 0x19b   : > { %1764 = vrot.lane.b32.xlu0 %v1763_v0, %s1939_s10  ;;  %v1783_v25 = vpack.i.bf16 %v2340_v14, %v937_v13  ;;  %v2353_v18 = vsel %vm389_vm2, %v962_v8, %v963_v11  ;;  %v1773_v57 = vpack.i.bf16 %v2346_v23, %v2320_v48  ;;  %v956_v35 = vrot.slane %v2346_v23, 2  ;;  %v1926_v11 = vld [vmem:[%s2598_s4 + $0x8] sm:$0xff]  }
 0x19c   : > { %v1788_v34 = vpack.i.bf16 %v2353_v18, %v961_v12  ;;  %v934_v16 = vsel %vm364_vm3, %v932_v30, %v933_v31  ;;  %v957_v36 = vrot.slane %v886_v24, 2  ;;  %v1778_v42 = vpack.i.bf16 %v2318_v7, %v2346_v23  ;;  %v2417_v30 = vld [vmem:[#allocation3 + $0x90] sm:$0xff] }
 0x19d   : > { %v1793_v41 = vpack.i.bf16 %v937_v13, %v934_v16  ;;  %v1290_v53 = vsel %vm737_vm4, %v1923_v49, 0  ;;  %v1803_v59 = vpack.i.bf16 %v934_v16, %v2332_v61  ;;  %v1925_v61 = vld [vmem:[%s2598_s4 + $0x10] sm:$0xff]  }
 0x19e   : > { %1784 = vrot.lane.b32.xlu1 %v1783_v25, %s1940_s11  ;;  %v958_v46 = vsel %vm389_vm2, %v956_v35, %v957_v36  ;;  %1562 = vmatpush3.bf16.msra.mxu1 %v1290_v53 }
 0x19f   : > { %1769 = vrot.lane.b32.xlu0 %v1768_v29, %s1938_s9  ;;  %v1798_v20 = vpack.i.bf16 %v961_v12, %v958_v46 }
 0x1a0   : > { %v1559_v33 = vpop.f32.mrf.mxu0 }
 0x1a1   : > { %v819_v32 = vmul.f32 %v1559_v33, %v2296_v26 }
 0x1a2   : > { %1789 = vrot.lane.b32.xlu1 %v1788_v34, %s1941_s14  ;;  %v791_v37 = vpop.f32.mrf.mxu0 }
 0x1a3   : > { %v834_v38 = vadd.f32 %v2301_v28, %v819_v32  ;;  %v817_v39 = vmul.f32 %v2296_v26, %v791_v37  ;;  %1774 = vrot.lane.b32.xlu0 %v1773_v57, %s1937_s8 }
 0x1a4   : > { %v1560_v40 = vpop.f32.mrf.mxu0 }
 0x1a5   : > { %v842_v44 = vmax.f32 %v834_v38, 0.0  ;;  %v832_v45 = vadd.f32 %v2301_v28, %v817_v39  ;;  %v820_v17 = vmul.f32 %v1560_v40, %v2296_v26 }
 0x1a6   : > { %1794 = vrot.lane.b32.xlu1 %v1793_v41, %s1939_s10  ;;  %v794_v47 = vpop.f32.mrf.mxu0 }
 0x1a7   : > { %v850_v50 = vmin.f32 %v842_v44, 20.0  ;;  %v840_v15 = vmax.f32 %v832_v45, 0.0  ;;  %v835_v51 = vadd.f32 %v2301_v28, %v820_v17  ;;  %v818_v52 = vmul.f32 %v2296_v26, %v794_v47  ;;  %1779 = vrot.lane.b32.xlu0 %v1778_v42, %s1942_s17  ;;  %v1924_v26 = vld [vmem:[%s2598_s4 + $0x18] sm:$0xff]  }
 0x1a8   : > { %1563 = vmatprep.subr.bf16.mxu1 %v1924_v26 }
 0x1a9   : > { %879 = vst.msk [vmem:[#allocation3 + $0x71] sm:$0xff] %vm288_vm0, %v850_v50  ;;  %v848_v54 = vmin.f32 %v840_v15, 20.0  ;;  %v843_v55 = vmax.f32 %v835_v51, 0.0  ;;  %v833_v58 = vadd.f32 %v2301_v28, %v818_v52  ;;  %v1808_v28 = vpack.i.bf16 %v958_v46, %v2344_v21  ;;  %1564 = vmatpush3.bf16.msra.mxu1 %v1924_v26 }
 0x1aa   : > { %1799 = vrot.lane.b32.xlu1 %v1798_v20, %s1938_s9  ;;  %1565 = vmatprep.subr.bf16.mxu1 %v1925_v61 }
 0x1ab   : > { %877 = vst.msk [vmem:[#allocation3 + $0x51] sm:$0xff] %vm288_vm0, %v848_v54  ;;  %v851_v60 = vmin.f32 %v843_v55, 20.0  ;;  %v841_v62 = vmax.f32 %v833_v58, 0.0  ;;  %1804 = vrot.lane.b32.xlu0 %v1803_v59, %s1940_s11 }
 0x1ad   : > { %880 = vst.msk [vmem:[#allocation3 + $0x81] sm:$0xff] %vm288_vm0, %v851_v60  ;;  %v849_v63 = vmin.f32 %v841_v62, 20.0  ;;  %1566 = vmatpush3.bf16.msra.mxu1 %v1925_v61  ;;  %v900_v60 = vld [vmem:[#allocation3 + $0x98] sm:$0x3] }
 0x1ae   : > { %1567 = vmatprep.subr.bf16.mxu1 %v1926_v11 }
 0x1af   : > { %878 = vst.msk [vmem:[#allocation3 + $0x61] sm:$0xff] %vm288_vm0, %v849_v63  ;;  %1809 = vrot.lane.b32.xlu0 %v1808_v28, %s1941_s14  ;;  %v984_v63 = vrot.slane %v2417_v30, 1  ;;  %v985_v28 = vrot.slane %v900_v60, 1 }
 0x1b0   : > { %v2409_v25 = vld [vmem:[#allocation3 + $0x70] sm:$0xff]  ;;  %v896_v36 = vld [vmem:[#allocation3 + $0x78] sm:$0x3] }
 0x1b1   : > { %1568 = vmatpush3.bf16.msra.mxu1 %v1926_v11  ;;  %v947_v40 = vrot.slane %v2409_v25, 1  ;;  %v971_v47 = vrot.slane %v2409_v25, 2  ;;  %v972_v49 = vrot.slane %v896_v36, 2  ;;  %v986_v11 = vsel %vm364_vm3, %v984_v63, %v985_v28 }
 0x1b2   : > { %v2399_v0 = vld [vmem:[#allocation3 + $0x50] sm:$0xff]  ;;  %v892_v8 = vld [vmem:[#allocation3 + $0x58] sm:$0x3]  ;;  %1569 = vmatprep.subr.bf16.mxu1 %v1927_v27 }
 0x1b3   : > { %1814 = vrot.lane.b32.xlu0 %v1793_v41, %s1943_s20  ;;  %v1823_v13 = vpack.i.bf16 %v2399_v0, %v2327_v56  ;;  %v965_v19 = vrot.slane %v2399_v0, 2  ;;  %v966_v21 = vrot.slane %v892_v8, 2  ;;  %v941_v31 = vrot.slane %v2399_v0, 1 }
 0x1b4   : > { %v897_v24 = vld [vmem:[#allocation3 + $0x80] sm:$0xff]  ;;  %v942_v12 = vrot.slane %v892_v8, 1  ;;  %v898_v32 = vld [vmem:[#allocation3 + $0x88] sm:$0x3]  ;;  %v948_v41 = vrot.slane %v896_v36, 1  ;;  %v973_v55 = vsel %vm389_vm2, %v971_v47, %v972_v49  ;;  %v987_v8 = vrot.slane %v2417_v30, 2 }
 0x1b5   : > { %1824 = vrot.lane.b32.xlu1 %v1823_v13, %s1942_s17  ;;  %v967_v22 = vsel %vm389_vm2, %v965_v19, %v966_v21  ;;  %v1828_v29 = vpack.i.bf16 %v897_v24, %v2409_v25  ;;  %1570 = vmatpush3.bf16.msra.mxu1 %v1927_v27  ;;  %v1833_v34 = vpack.i.bf16 %v2417_v30, %v897_v24  ;;  %v976_v38 = vrot.slane %v897_v24, 1 }
 0x1b6   : > { %v1848_v33 = vpack.i.bf16 %v967_v22, %v2353_v18  ;;  %v943_v57 = vsel %vm364_vm3, %v941_v31, %v942_v12  ;;  %v2426_v16 = vld [vmem:[#allocation3 + $0x60] sm:$0xff]  ;;  %v894_v37 = vld [vmem:[#allocation3 + $0x68] sm:$0x3]  ;;  %v977_v18 = vrot.slane %v898_v32, 1  ;;  %v980_v17 = vrot.slane %v898_v32, 2 }
 0x1b7   : > { %1819 = vrot.lane.b32.xlu0 %v1798_v20, %s1944_s23  ;;  %v1838_v35 = vpack.i.bf16 %v943_v57, %v2340_v14  ;;  %v1858_v39 = vpack.i.bf16 %v2426_v16, %v2399_v0  ;;  %v944_v42 = vrot.slane %v2426_v16, 1  ;;  %v945_v44 = vrot.slane %v894_v37, 1 }
 0x1b8   : > { %v978_v45 = vsel %vm364_vm3, %v976_v38, %v977_v18  ;;  %v979_v14 = vrot.slane %v897_v24, 2  ;;  %v1863_v46 = vpack.i.bf16 %v2409_v25, %v2426_v16  ;;  %v949_v50 = vsel %vm364_vm3, %v947_v40, %v948_v41 }
 0x1b9   : > { %1829 = vrot.lane.b32.xlu1 %v1828_v29, %s1937_s8  ;;  %v946_v15 = vsel %vm364_vm3, %v944_v42, %v945_v44  ;;  %v968_v51 = vrot.slane %v2426_v16, 2  ;;  %v969_v52 = vrot.slane %v894_v37, 2  ;;  %v1868_v20 = vpack.i.bf16 %v978_v45, %v949_v50 }
 0x1ba   : > { %v981_v53 = vsel %vm389_vm2, %v979_v14, %v980_v17  ;;  %v1893_v54 = vpack.i.bf16 %v946_v15, %v943_v57  ;;  %v1878_v62 = vpack.i.bf16 %v949_v50, %v946_v15  ;;  %v988_v13 = vrot.slane %v900_v60, 2 }
 0x1bb   : > { %1849 = vrot.lane.b32.xlu0 %v1848_v33, %s1944_s23  ;;  %v970_v58 = vsel %vm389_vm2, %v968_v51, %v969_v52  ;;  %v1873_v59 = vpack.i.bf16 %v981_v53, %v973_v55  ;;  %v1888_v19 = vpack.i.bf16 %v986_v11, %v978_v45 }
 0x1bc   : > { %v1898_v26 = vpack.i.bf16 %v970_v58, %v967_v22  ;;  %v1883_v61 = vpack.i.bf16 %v973_v55, %v970_v58  ;;  %v989_v21 = vsel %vm389_vm2, %v987_v8, %v988_v13 }
 0x1bd   : > { %1834 = vrot.lane.b32.xlu1 %v1833_v34, %s1942_s17  ;;  %v1913_v24 = vpack.i.bf16 %v989_v21, %v981_v53 }
 0x1bf   : > { %1854 = vrot.lane.b32.xlu0 %v1848_v33, %s1938_s9 }
 0x1c1   : > { %1839 = vrot.lane.b32.xlu1 %v1838_v35, %s1943_s20 }
 0x1c3   : > { %1859 = vrot.lane.b32.xlu0 %v1858_v39, %s1937_s8 }
 0x1c5   : > { %1844 = vrot.lane.b32.xlu1 %v1838_v35, %s1939_s10 }
 0x1c7   : > { %1864 = vrot.lane.b32.xlu0 %v1863_v46, %s1942_s17 }
 0x1c9   : > { %1869 = vrot.lane.b32.xlu1 %v1868_v20, %s1940_s11 }
 0x1cb   : > { %1894 = vrot.lane.b32.xlu0 %v1893_v54, %s1940_s11 }
 0x1cd   : > { %1874 = vrot.lane.b32.xlu1 %v1873_v59, %s1941_s14 }
 0x1cf   : > { %1899 = vrot.lane.b32.xlu0 %v1898_v26, %s1941_s14 }
 0x1d1   : > { %1879 = vrot.lane.b32.xlu1 %v1878_v62, %s1939_s10 }
 0x1d3   : > { %1904 = vrot.lane.b32.xlu0 %v1878_v62, %s1943_s20 }
 0x1d5   : > { %1884 = vrot.lane.b32.xlu1 %v1883_v61, %s1938_s9 }
 0x1d7   : > { %1909 = vrot.lane.b32.xlu0 %v1883_v61, %s1944_s23 }
 0x1d9   : > { %1889 = vrot.lane.b32.xlu1 %v1888_v19, %s1943_s20  ;;  %s2567_s20 = scalar_lea.vmem %s2601_s7, %s1523_s27 }
 0x1dd   : > { %1914 = vrot.lane.b32.xlu1 %v1913_v24, %s1944_s23 }
 0x20c   : > { %v1760_v22 = vpop.permute.xlu1 %1759 }
 0x20d   : > { %v1765_v27 = vpop.permute.xlu0 %1764 }
 0x20e   : > { %v1767_v32 = vunpack.i.h.bf16 %v1765_v27  ;;  %v1766_v35 = vunpack.i.l.bf16 %v1765_v27 }
 0x210   : > { %v2462_v29 = vpop.permute.xlu1 %1784  ;;  %v1183_v42 = vsel %vm288_vm0, %v2320_v48, %v1767_v32  ;;  %v1182_v44 = vsel %vm288_vm0, %v2313_v43, %v1766_v35 }
 0x211   : > { %v1770_v30 = vpop.permute.xlu0 %1769 }
 0x212   : > { %v1772_v36 = vunpack.i.h.bf16 %v1770_v30  ;;  %v1771_v37 = vunpack.i.l.bf16 %v1770_v30 }
 0x214   : > { %v2464_v12 = vpop.permute.xlu1 %1789  ;;  %v1190_v46 = vsel %vm630_vm5, %v1182_v44, %v1771_v37  ;;  %v1191_v47 = vsel %vm630_vm5, %v1183_v42, %v1772_v36  ;;  %v1787_v37 = vunpack.i.h.bf16 %v2462_v29 }
 0x215   : > { %v1775_v31 = vpop.permute.xlu0 %1774  ;;  %v1792_v44 = vunpack.i.h.bf16 %v2464_v12 }
 0x216   : > { %v1777_v38 = vunpack.i.h.bf16 %v1775_v31  ;;  %v1776_v18 = vunpack.i.l.bf16 %v1775_v31  ;;  %v1762_v31 = vunpack.i.h.bf16 %v1760_v22 }
 0x218   : > { %v1795_v34 = vpop.permute.xlu1 %1794  ;;  %v1199_v49 = vsel %vm639_vm6, %v1191_v47, %v1777_v38  ;;  %v1198_v50 = vsel %vm639_vm6, %v1190_v46, %v1776_v18  ;;  %v1786_v38 = vunpack.i.l.bf16 %v2462_v29 }
 0x219   : > { %v1780_v33 = vpop.permute.xlu0 %1779  ;;  %v1797_v15 = vunpack.i.h.bf16 %v1795_v34  ;;  %v1796_v51 = vunpack.i.l.bf16 %v1795_v34 }
 0x21a   : > { %v1782_v60 = vunpack.i.h.bf16 %v1780_v33  ;;  %v1781_v62 = vunpack.i.l.bf16 %v1780_v33  ;;  %v1761_v33 = vunpack.i.l.bf16 %v1760_v22 }
 0x21b   : > { %v1185_v63 = vsel %vm288_vm0, %v2318_v7, %v1797_v15  ;;  %v1184_v28 = vsel %vm288_vm0, %v2346_v23, %v1796_v51 }
 0x21c   : > { %v1800_v45 = vpop.permute.xlu1 %1799 }
 0x21d   : > { %v1805_v57 = vpop.permute.xlu0 %1804  ;;  %v1802_v20 = vunpack.i.h.bf16 %v1800_v45  ;;  %v1801_v53 = vunpack.i.l.bf16 %v1800_v45  ;;  %v1791_v45 = vunpack.i.l.bf16 %v2464_v12 }
 0x21e   : > { %v1807_v40 = vunpack.i.h.bf16 %v1805_v57  ;;  %v1806_v41 = vunpack.i.l.bf16 %v1805_v57 }
 0x21f   : > { %v1192_v21 = vsel %vm630_vm5, %v1184_v28, %v1801_v53  ;;  %v1193_v24 = vsel %vm630_vm5, %v1185_v63, %v1802_v20 }
 0x220   : > { %v1207_v48 = vsel %vm648_vm7, %v1199_v49, %v1807_v40  ;;  %v1206_v43 = vsel %vm648_vm7, %v1198_v50, %v1806_v41  ;;  %v1200_v35 = vsel %vm639_vm6, %v1192_v21, %v1761_v33  ;;  %v1201_v36 = vsel %vm639_vm6, %v1193_v24, %v1762_v31 }
 0x221   : > { %v1810_v39 = vpop.permute.xlu0 %1809  ;;  %v1208_v22 = vsel %vm648_vm7, %v1200_v35, %v1786_v38 }
 0x222   : > { %v1812_v14 = vunpack.i.h.bf16 %v1810_v39  ;;  %v1811_v17 = vunpack.i.l.bf16 %v1810_v39  ;;  %v1209_v39 = vsel %vm648_vm7, %v1201_v36, %v1787_v37 }
 0x223   : > { %v1217_v29 = vsel %vm657_vm8, %v1209_v39, %v1792_v44 }
 0x224   : > { %v1214_v54 = vsel %vm657_vm8, %v1206_v43, %v1811_v17  ;;  %v1215_v55 = vsel %vm657_vm8, %v1207_v48, %v1812_v14  ;;  %v1216_v17 = vsel %vm657_vm8, %v1208_v22, %v1791_v45 }
 0x225   : > { %v1815_v52 = vpop.permute.xlu0 %1814  ;;  %v1222_v13 = vsel %vm666_vm9, %v1214_v54, %v1781_v62  ;;  %v1223_v19 = vsel %vm666_vm9, %v1215_v55, %v1782_v60 }
 0x226   : > { %v1817_v58 = vunpack.i.h.bf16 %v1815_v52  ;;  %v1816_v59 = vunpack.i.l.bf16 %v1815_v52 }
 0x227   : > { %v1825_v26 = vpop.permute.xlu1 %1824 }
 0x228   : > { %v1230_v30 = vsel %vm675_vm10, %v1222_v13, %v1816_v59  ;;  %v1231_v7 = vsel %vm675_vm10, %v1223_v19, %v1817_v58  ;;  %v1827_v40 = vunpack.i.h.bf16 %v1825_v26  ;;  %v1826_v41 = vunpack.i.l.bf16 %v1825_v26 }
 0x229   : > { %v1820_v61 = vpop.permute.xlu0 %1819 }
 0x22a   : > { %v1822_v8 = vunpack.i.h.bf16 %v1820_v61  ;;  %v1821_v11 = vunpack.i.l.bf16 %v1820_v61  ;;  %v1225_v49 = vsel %vm666_vm9, %v1217_v29, %v1827_v40  ;;  %v1224_v50 = vsel %vm666_vm9, %v1216_v17, %v1826_v41 }
 0x22b   : > { %v2486_v27 = vpop.permute.xlu1 %1829 }
 0x22c   : > { %v1238_v23 = vsel %vm684_vm11, %v1230_v30, %v1821_v11  ;;  %v1239_v34 = vsel %vm684_vm11, %v1231_v7, %v1822_v8 }
 0x22d   : > { %v1850_v57 = vpop.permute.xlu0 %1849  ;;  %v1246_v32 = vpack.c.bf16 %v1239_v34, %v1238_v23  ;;  %v1832_v23 = vunpack.i.h.bf16 %v2486_v27 }
 0x22e   : > { %v1852_v15 = vunpack.i.h.bf16 %v1850_v57  ;;  %v1851_v51 = vunpack.i.l.bf16 %v1850_v57 }
 0x22f   : > { %1571 = vmatprep.mubr.msk.bf16.mxu1 %vm724_vm12, %v1246_v32  ;;  %v2497_v18 = vpop.permute.xlu1 %1834 }
 0x230   : > { %v1836_v57 = vunpack.i.l.bf16 %v2497_v18 }
 0x231   : > { %v1855_v42 = vpop.permute.xlu0 %1854 }
 0x232   : > { %v1857_v28 = vunpack.i.h.bf16 %v1855_v42  ;;  %v1856_v61 = vunpack.i.l.bf16 %v1855_v42 }
 0x233   : > { %v1840_v14 = vpop.permute.xlu1 %1839 }
 0x234   : > { %v1842_v46 = vunpack.i.h.bf16 %v1840_v14  ;;  %v1841_v47 = vunpack.i.l.bf16 %v1840_v14 }
 0x235   : > { %v1860_v52 = vpop.permute.xlu0 %1859 }
 0x236   : > { %v1233_v20 = vsel %vm675_vm10, %v1225_v49, %v1842_v46  ;;  %v1232_v53 = vsel %vm675_vm10, %v1224_v50, %v1841_v47  ;;  %v1862_v30 = vunpack.i.h.bf16 %v1860_v52  ;;  %v1861_v7 = vunpack.i.l.bf16 %v1860_v52 }
 0x237   : > { %v1845_v48 = vpop.permute.xlu1 %1844  ;;  %v1240_v12 = vsel %vm684_vm11, %v1232_v53, %v1851_v51  ;;  %v1241_v43 = vsel %vm684_vm11, %v1233_v20, %v1852_v15 }
 0x238   : > { %v1247_v54 = vpack.c.bf16 %v1241_v43, %v1240_v12  ;;  %v1847_v58 = vunpack.i.h.bf16 %v1845_v48  ;;  %v1846_v59 = vunpack.i.l.bf16 %v1845_v48 }
 0x239   : > { %v1865_v55 = vpop.permute.xlu0 %1864 }
 0x23a   : > { %1572 = vmatmul.mubr.msk.bf16.vlgmr.msra.gmra.mxu1 %vm724_vm12, %v1247_v54  ;;  %v1187_v62 = vsel %vm288_vm0, %v2399_v0, %v1847_v58  ;;  %v1186_v63 = vsel %vm288_vm0, %v2327_v56, %v1846_v59  ;;  %v1831_v0 = vunpack.i.l.bf16 %v2486_v27  ;;  %v1837_v56 = vunpack.i.h.bf16 %v2497_v18 }
 0x23b   : > { %v1870_v26 = vpop.permute.xlu1 %1869  ;;  %v1195_v11 = vsel %vm630_vm5, %v1187_v62, %v1857_v28  ;;  %v1194_v13 = vsel %vm630_vm5, %v1186_v63, %v1856_v61  ;;  %v1867_v40 = vunpack.i.h.bf16 %v1865_v55  ;;  %v1866_v41 = vunpack.i.l.bf16 %v1865_v55 }
 0x23c   : > { %v1202_v32 = vsel %vm639_vm6, %v1194_v13, %v1861_v7  ;;  %v1203_v35 = vsel %vm639_vm6, %v1195_v11, %v1862_v30  ;;  %v1872_v44 = vunpack.i.h.bf16 %v1870_v26  ;;  %v1871_v45 = vunpack.i.l.bf16 %v1870_v26 }
 0x23d   : > { %v1895_v60 = vpop.permute.xlu0 %1894 }
 0x23e   : > { %v1897_v19 = vunpack.i.h.bf16 %v1895_v60  ;;  %v1896_v21 = vunpack.i.l.bf16 %v1895_v60 }
 0x23f   : > { %v1875_v8 = vpop.permute.xlu1 %1874 }
 0x240   : > { %v1211_v36 = vsel %vm648_vm7, %v1203_v35, %v1897_v19  ;;  %v1210_v37 = vsel %vm648_vm7, %v1202_v32, %v1896_v21  ;;  %v1877_v29 = vunpack.i.h.bf16 %v1875_v8  ;;  %v1876_v46 = vunpack.i.l.bf16 %v1875_v8 }
 0x241   : > { %v1900_v24 = vpop.permute.xlu0 %1899 }
 0x242   : > { %v1902_v31 = vunpack.i.h.bf16 %v1900_v24  ;;  %v1901_v33 = vunpack.i.l.bf16 %v1900_v24 }
 0x243   : > { %v1880_v34 = vpop.permute.xlu1 %1879 }
 0x244   : > { %v1882_v38 = vunpack.i.h.bf16 %v1880_v34  ;;  %v1881_v22 = vunpack.i.l.bf16 %v1880_v34  ;;  %v1218_v27 = vsel %vm657_vm8, %v1210_v37, %v1901_v33  ;;  %v1219_v42 = vsel %vm657_vm8, %v1211_v36, %v1902_v31  ;;  %v1519_v34 = vld [vmem:[%s2599_s5] ss:$0 sm:$0xff] }
 0x245   : > { %v1905_v39 = vpop.permute.xlu0 %1904  ;;  %v1226_v51 = vsel %vm666_vm9, %v1218_v27, %v1866_v41  ;;  %v1227_v52 = vsel %vm666_vm9, %v1219_v42, %v1867_v40 }
 0x246   : > { %v1907_v18 = vunpack.i.h.bf16 %v1905_v39  ;;  %v1906_v14 = vunpack.i.l.bf16 %v1905_v39  ;;  %v1189_v50 = vsel %vm288_vm0, %v2409_v25, %v1882_v38  ;;  %v1188_v15 = vsel %vm288_vm0, %v2426_v16, %v1881_v22 }
 0x247   : > { %v1885_v17 = vpop.permute.xlu1 %1884 }
 0x248   : > { %v1887_v47 = vunpack.i.h.bf16 %v1885_v17  ;;  %v1886_v49 = vunpack.i.l.bf16 %v1885_v17  ;;  %v1234_v54 = vsel %vm675_vm10, %v1226_v51, %v1906_v14  ;;  %v1235_v55 = vsel %vm675_vm10, %v1227_v52, %v1907_v18 }
 0x249   : > { %v1910_v20 = vpop.permute.xlu0 %1909 }
 0x24a   : > { %v1196_v53 = vsel %vm630_vm5, %v1188_v15, %v1886_v49  ;;  %v1197_v48 = vsel %vm630_vm5, %v1189_v50, %v1887_v47  ;;  %v1912_v12 = vunpack.i.h.bf16 %v1910_v20  ;;  %v1911_v43 = vunpack.i.l.bf16 %v1910_v20 }
 0x24b   : > { %v1204_v25 = vsel %vm639_vm6, %v1196_v53, %v1831_v0  ;;  %v1205_v58 = vsel %vm639_vm6, %v1197_v48, %v1832_v23  ;;  %v1890_v16 = vpop.permute.xlu1 %1889 }
 0x24c   : > { %v1212_v59 = vsel %vm648_vm7, %v1204_v25, %v1871_v45  ;;  %v1213_v26 = vsel %vm648_vm7, %v1205_v58, %v1872_v44  ;;  %v1242_v60 = vsel %vm684_vm11, %v1234_v54, %v1911_v43  ;;  %v1243_v62 = vsel %vm684_vm11, %v1235_v55, %v1912_v12 }
 0x24d   : > { %v1248_v63 = vpack.c.bf16 %v1243_v62, %v1242_v60  ;;  %v1892_v28 = vunpack.i.h.bf16 %v1890_v16  ;;  %v1891_v61 = vunpack.i.l.bf16 %v1890_v16  ;;  %v1220_v8 = vsel %vm657_vm8, %v1212_v59, %v1876_v46 }
 0x24e   : > { %v1221_v11 = vsel %vm657_vm8, %v1213_v26, %v1877_v29  ;;  %v1228_v13 = vsel %vm666_vm9, %v1220_v8, %v1836_v57  ;;  %v1520_v57 = vld [vmem:[%s2600_s6] ss:$0 sm:$0xff] }
 0x24f   : > { %v1229_v19 = vsel %vm666_vm9, %v1221_v11, %v1837_v56  ;;  %1575 = vmatprep.mubr.msk.bf16.mxu1 %vm724_vm12, %v1248_v63  ;;  %v1915_v21 = vpop.permute.xlu1 %1914  ;;  %v1236_v7 = vsel %vm675_vm10, %v1228_v13, %v1891_v61 }
 0x250   : > { %v1917_v24 = vunpack.i.h.bf16 %v1915_v21  ;;  %v1916_v30 = vunpack.i.l.bf16 %v1915_v21  ;;  %v1237_v31 = vsel %vm675_vm10, %v1229_v19, %v1892_v28 }
 0x252   : > { %v1244_v33 = vsel %vm684_vm11, %v1236_v7, %v1916_v30  ;;  %v1245_v23 = vsel %vm684_vm11, %v1237_v31, %v1917_v24 }
 0x253   : > { %v1249_v0 = vpack.c.bf16 %v1245_v23, %v1244_v33 }
 0x255   : > { %1576 = vmatmul.mubr.msk.bf16.gmra.mxu1 %vm724_vm12, %v1249_v0 }
 0x2fa   : > { %v1573_v56 = vpop.f32.mrf.mxu1 }
 0x2fb   : > { %v1366_v32 = vmul.f32 %v1573_v56, %v1519_v34 }
 0x2fc   : > { %v1326_v35 = vpop.f32.mrf.mxu1 }
 0x2fd   : > { %v1381_v36 = vadd.f32 %v1520_v57, %v1366_v32  ;;  %v1364_v37 = vmul.f32 %v1519_v34, %v1326_v35 }
 0x2fe   : > { %v1574_v38 = vpop.f32.mrf.mxu1 }
 0x2ff   : > { %v1389_v22 = vmax.f32 %v1381_v36, 0.0  ;;  %v1379_v39 = vadd.f32 %v1520_v57, %v1364_v37  ;;  %v1367_v40 = vmul.f32 %v1574_v38, %v1519_v34 }
 0x300   : > { %v1329_v41 = vpop.f32.mrf.mxu1 }
 0x301   : > { %v1397_v27 = vmin.f32 %v1389_v22, 20.0  ;;  %v1387_v42 = vmax.f32 %v1379_v39, 0.0  ;;  %v1382_v44 = vadd.f32 %v1520_v57, %v1367_v40  ;;  %v1365_v45 = vmul.f32 %v1519_v34, %v1329_v41 }
 0x303   : > { %v1405_v18 = vadd.f32 %v1397_v27, %v2051_v1  ;;  %v1395_v14 = vmin.f32 %v1387_v42, 20.0  ;;  %v1390_v17 = vmax.f32 %v1382_v44, 0.0  ;;  %v1380_v29 = vadd.f32 %v1520_v57, %v1365_v45 }
 0x305   : > { %v1413_v46 = vmax.f32 %v1405_v18, 0.0  ;;  %v1403_v47 = vadd.f32 %v1395_v14, %v2055_v3  ;;  %v1398_v49 = vmin.f32 %v1390_v17, 20.0  ;;  %v1388_v50 = vmax.f32 %v1380_v29, 0.0 }
 0x307   : > { %v1421_v15 = vmin.f32 %v1413_v46, 20.0  ;;  %v1411_v1 = vmax.f32 %v1403_v47, 0.0  ;;  %v1406_v51 = vadd.f32 %v1398_v49, %v2053_v2  ;;  %v1396_v52 = vmin.f32 %v1388_v50, 20.0 }
 0x309   : > { %1429 = vst.msk [vmem:[%s2567_s20 + $0x10] sm:$0xff] %vm288_vm0, %v1421_v15  ;;  %v1419_v3 = vmin.f32 %v1411_v1, 20.0  ;;  %v1414_v20 = vmax.f32 %v1406_v51, 0.0  ;;  %v1404_v53 = vadd.f32 %v1396_v52, %v2061_v4 }
 0x30b   : > { %1427 = vst.msk [vmem:[%s2567_s20] sm:$0xff] %vm288_vm0, %v1419_v3  ;;  %v1422_v48 = vmin.f32 %v1414_v20, 20.0  ;;  %v1412_v12 = vmax.f32 %v1404_v53, 0.0 }
 0x30d   : > { %1430 = vst.msk [vmem:[%s2567_s20 + $0x18] sm:$0xff] %vm288_vm0, %v1422_v48  ;;  %v1420_v43 = vmin.f32 %v1412_v12, 20.0 }
 0x30f   : > { %1428 = vst.msk [vmem:[%s2567_s20 + $0x8] sm:$0xff] %vm288_vm0, %v1420_v43 }
 0x315   : > { %v1577_v54 = vpop.f32.mrf.mxu1 }
 0x316   : > { %v1370_v55 = vmul.f32 %v1577_v54, %v1519_v34 }
 0x317   : > { %v1342_v25 = vpop.f32.mrf.mxu1 }
 0x318   : > { %v1385_v2 = vadd.f32 %v1520_v57, %v1370_v55  ;;  %v1368_v58 = vmul.f32 %v1519_v34, %v1342_v25 }
 0x319   : > { %v1578_v16 = vpop.f32.mrf.mxu1 }
 0x31a   : > { %v1393_v59 = vmax.f32 %v1385_v2, 0.0  ;;  %v1383_v26 = vadd.f32 %v1520_v57, %v1368_v58  ;;  %v1371_v60 = vmul.f32 %v1578_v16, %v1519_v34 }
 0x31b   : > { %v1345_v62 = vpop.f32.mrf.mxu1 }
 0x31c   : > { %v1401_v4 = vmin.f32 %v1393_v59, 20.0  ;;  %v1391_v63 = vmax.f32 %v1383_v26, 0.0  ;;  %v1386_v28 = vadd.f32 %v1520_v57, %v1371_v60  ;;  %v1369_v61 = vmul.f32 %v1519_v34, %v1345_v62 }
 0x31e   : > { %v1409_v8 = vadd.f32 %v1401_v4, %v2075_v9  ;;  %v1399_v11 = vmin.f32 %v1391_v63, 20.0  ;;  %v1394_v13 = vmax.f32 %v1386_v28, 0.0  ;;  %v1384_v19 = vadd.f32 %v1520_v57, %v1369_v61 }
 0x320   : > { %v1417_v21 = vmax.f32 %v1409_v8, 0.0  ;;  %v1407_v24 = vadd.f32 %v1399_v11, %v2065_v5  ;;  %v1402_v30 = vmin.f32 %v1394_v13, 20.0  ;;  %v1392_v7 = vmax.f32 %v1384_v19, 0.0 }
 0x322   : > { %v1425_v31 = vmin.f32 %v1417_v21, 20.0  ;;  %v1415_v33 = vmax.f32 %v1407_v24, 0.0  ;;  %v1410_v23 = vadd.f32 %v1402_v30, %v2081_v10  ;;  %v1400_v0 = vmin.f32 %v1392_v7, 20.0 }
 0x324   : > { %1433 = vst.msk [vmem:[%s2567_s20 + $0x30] sm:$0xff] %vm288_vm0, %v1425_v31  ;;  %v1423_v34 = vmin.f32 %v1415_v33, 20.0  ;;  %v1418_v9 = vmax.f32 %v1410_v23, 0.0  ;;  %v1408_v56 = vadd.f32 %v1400_v0, %v2067_v6 }
 0x326   : > { %1431 = vst.msk [vmem:[%s2567_s20 + $0x20] sm:$0xff] %vm288_vm0, %v1423_v34  ;;  %v1426_v57 = vmin.f32 %v1418_v9, 20.0  ;;  %v1416_v32 = vmax.f32 %v1408_v56, 0.0 }
 0x328   : > { %1434 = vst.msk [vmem:[%s2567_s20 + $0x38] sm:$0xff] %vm288_vm0, %v1426_v57  ;;  %v1424_v5 = vmin.f32 %v1416_v32, 20.0 }
 0x32a   : > { %1432 = vst.msk [vmem:[%s2567_s20 + $0x28] sm:$0xff] %vm288_vm0, %v1424_v5 }
 0x32b PF: > { %s17_s24 = sadd.s32 1, %s1934_s24  }
 0x32c   : > { %p14_p4 = scmp.ge.s32.totalorder %s17_s24, 4  }
 0x32e   :  { %16 = sbr.rel (!%p14_p4) target bundleno = 1 (0x1), region = 80 }

</bundles_post_ra>
